<compile_context>
chip_gen: v6e
topology: v6e:2x2x1
jax: 0.10.0
libtpu: 0.0.40
codegen_flags: <defaults>
</compile_context>

<pallas_src>
import functools
import math

import jax
import jax.numpy as jnp
from jax.experimental import pallas as pl
from jax.experimental.pallas import tpu as pltpu

# ---------------- model hyper-parameters (small, BERT-like) ----------------
VOCAB = 128
MAX_POS = 16
TYPE_VOCAB = 2
HIDDEN = 32
NHEADS = 2
HEAD_DIM = HIDDEN // NHEADS
INTERMEDIATE = 64
NLAYERS = 2
NUM_LABELS = 2
HEADS_OUT = NUM_LABELS + 1      # fused task (2) + domain (1) logits
LN_EPS = 1e-12
INIT_RANGE = 0.02               # base_config.initializer_range


# ---------------------------- fused Pallas kernel ----------------------------
def _dann_fused_kernel(emb_ref, bias_ref, eg_ref, eb_ref,
                       wqkv_ref, bqkv_ref, wo_ref, bo_ref,
                       ln1g_ref, ln1b_ref, w1_ref, b1_ref,
                       w2_ref, b2_ref, ln2g_ref, ln2b_ref,
                       wp_ref, bp_ref, wh_ref, bh_ref,
                       out_ref):
    """Full DANN forward for one batch element; all intermediates stay in VMEM."""

    def layernorm(x, g, b):
        mu = jnp.mean(x, axis=-1, keepdims=True)
        var = jnp.mean((x - mu) * (x - mu), axis=-1, keepdims=True)
        return (x - mu) * jax.lax.rsqrt(var + LN_EPS) * g + b

    def gelu(x):  # exact (erf) GELU, as in HF BERT
        return 0.5 * x * (1.0 + jax.lax.erf(x * (1.0 / math.sqrt(2.0))))

    x = emb_ref[0].astype(jnp.float32)        # (S, H)  summed embeddings
    mask_bias = bias_ref[0]                   # (1, S)  (1 - mask) * -1e9
    h = layernorm(x, eg_ref[...], eb_ref[...])
    # TODO(synk): all Dropout layers are treated as identity (deterministic / eval parity).

    for l in range(NLAYERS):
        # Fused QKV projection (wq/bq pre-scaled by 1/sqrt(head_dim) at pack time).
        qkv = jnp.dot(h, wqkv_ref[l], preferred_element_type=jnp.float32) + bqkv_ref[l]
        wo_l = wo_ref[l]                                              # (H, H)
        attn_out = bo_ref[l]                                          # (1, H)
        for hd in range(NHEADS):
            lo = hd * HEAD_DIM
            q = qkv[:, lo:lo + HEAD_DIM]                              # (S, D)
            k = qkv[:, HIDDEN + lo:HIDDEN + lo + HEAD_DIM]            # (S, D)
            v = qkv[:, 2 * HIDDEN + lo:2 * HIDDEN + lo + HEAD_DIM]    # (S, D)
            scores = jax.lax.dot_general(
                q, k, (((1,), (1,)), ((), ())),
                preferred_element_type=jnp.float32) + mask_bias       # (S, S)
            m = jnp.max(scores, axis=-1, keepdims=True)
            p = jnp.exp(scores - m)
            p = p * pl.reciprocal(jnp.sum(p, axis=-1, keepdims=True), approx=True)
            ctx_h = jnp.dot(p, v, preferred_element_type=jnp.float32)  # (S, D)
            # Per-head output projection: sum_h ctx_h @ wo[h-rows] == concat(heads) @ wo
            attn_out = attn_out + jnp.dot(ctx_h, wo_l[lo:lo + HEAD_DIM, :],
                                          preferred_element_type=jnp.float32)
        h = layernorm(attn_out + h, ln1g_ref[l], ln1b_ref[l])
        ff = gelu(jnp.dot(h, w1_ref[l], preferred_element_type=jnp.float32) + b1_ref[l])
        ff = jnp.dot(ff, w2_ref[l], preferred_element_type=jnp.float32) + b2_ref[l]
        h = layernorm(ff + h, ln2g_ref[l], ln2b_ref[l])

    # BertPooler: dense + tanh on the [CLS] token, then fused task+domain heads.
    cls = h[0:1, :]                                                    # (1, H)
    pooled = jnp.tanh(jnp.dot(cls, wp_ref[...],
                              preferred_element_type=jnp.float32) + bp_ref[...])
    logits = jnp.dot(pooled, wh_ref[...],
                     preferred_element_type=jnp.float32) + bh_ref[...]  # (1, 3)
    out_ref[0] = logits.astype(out_ref.dtype)


# --------------------------- parameter init / pack ---------------------------
def init_params(key):
    keys = iter(jax.random.split(key, 32))

    def normal(shape):
        return INIT_RANGE * jax.random.normal(next(keys), shape, jnp.float32)

    params = {
        "word_emb": normal((VOCAB, HIDDEN)),
        "pos_emb": normal((MAX_POS, HIDDEN)),
        "type_emb": normal((TYPE_VOCAB, HIDDEN)),
        "emb_ln_g": jnp.ones((HIDDEN,), jnp.float32),
        "emb_ln_b": jnp.zeros((HIDDEN,), jnp.float32),
        "layers": [],
        # BertPooler
        "wp": normal((HIDDEN, HIDDEN)), "bp": jnp.zeros((HIDDEN,), jnp.float32),
        # SentiMentClf (2 labels)
        "wt": normal((HIDDEN, NUM_LABELS)), "bt": jnp.zeros((NUM_LABELS,), jnp.float32),
        # Discriminator (1 logit)
        "wd": normal((HIDDEN, 1)), "bd": jnp.zeros((1,), jnp.float32),
    }
    for _ in range(NLAYERS):
        params["layers"].append({
            "wq": normal((HIDDEN, HIDDEN)), "bq": jnp.zeros((HIDDEN,), jnp.float32),
            "wk": normal((HIDDEN, HIDDEN)), "bk": jnp.zeros((HIDDEN,), jnp.float32),
            "wv": normal((HIDDEN, HIDDEN)), "bv": jnp.zeros((HIDDEN,), jnp.float32),
            "wo": normal((HIDDEN, HIDDEN)), "bo": jnp.zeros((HIDDEN,), jnp.float32),
            "ln1_g": jnp.ones((HIDDEN,), jnp.float32),
            "ln1_b": jnp.zeros((HIDDEN,), jnp.float32),
            "w1": normal((HIDDEN, INTERMEDIATE)),
            "b1": jnp.zeros((INTERMEDIATE,), jnp.float32),
            "w2": normal((INTERMEDIATE, HIDDEN)),
            "b2": jnp.zeros((HIDDEN,), jnp.float32),
            "ln2_g": jnp.ones((HIDDEN,), jnp.float32),
            "ln2_b": jnp.zeros((HIDDEN,), jnp.float32),
        })
    return params


def pack_params(p):
    """Fuse QKV / heads, fold the attention scale, stack per-layer weights."""
    scale = 1.0 / math.sqrt(HEAD_DIM)
    stacks = {k: [] for k in ("wqkv", "bqkv", "wo", "bo", "ln1_g", "ln1_b",
                              "w1", "b1", "w2", "b2", "ln2_g", "ln2_b")}
    for lp in p["layers"]:
        stacks["wqkv"].append(jnp.concatenate(
            [lp["wq"] * scale, lp["wk"], lp["wv"]], axis=1))            # (H, 3H)
        stacks["bqkv"].append(jnp.concatenate(
            [lp["bq"] * scale, lp["bk"], lp["bv"]])[None, :])           # (1, 3H)
        stacks["wo"].append(lp["wo"]);        stacks["bo"].append(lp["bo"][None, :])
        stacks["ln1_g"].append(lp["ln1_g"][None, :]); stacks["ln1_b"].append(lp["ln1_b"][None, :])
        stacks["w1"].append(lp["w1"]);        stacks["b1"].append(lp["b1"][None, :])
        stacks["w2"].append(lp["w2"]);        stacks["b2"].append(lp["b2"][None, :])
        stacks["ln2_g"].append(lp["ln2_g"][None, :]); stacks["ln2_b"].append(lp["ln2_b"][None, :])

    packed = {k: jnp.stack(v) for k, v in stacks.items()}
    packed.update({
        "word_emb": p["word_emb"], "pos_emb": p["pos_emb"], "type_emb": p["type_emb"],
        "emb_ln_g": p["emb_ln_g"][None, :], "emb_ln_b": p["emb_ln_b"][None, :],
        "wp": p["wp"], "bp": p["bp"][None, :],
        # Fused task (2 cols) + domain (1 col) classifier heads.
        "w_heads": jnp.concatenate([p["wt"], p["wd"]], axis=1),         # (H, 3)
        "b_heads": jnp.concatenate([p["bt"], p["bd"]])[None, :],        # (1, 3)
    })
    return packed


# ------------------------------ forward pass --------------------------------
@functools.partial(jax.jit, static_argnames=("train_mode",))
def dann_forward(packed, input_ids, attention_mask, train_mode=True):
    B, S = input_ids.shape

    # Embedding-table gathers are data-dependent lookups -> kept as XLA glue;
    # everything from the embedding LayerNorm onward runs in the fused kernel.
    emb = (packed["word_emb"][input_ids]
           + packed["pos_emb"][jnp.arange(S)][None, :, :]
           + packed["type_emb"][jnp.zeros_like(input_ids)])             # (B, S, H)
    mask_bias = ((1.0 - attention_mask.astype(jnp.float32)) * -1e9
                 ).reshape(B, 1, S)

    def full_spec(arr):
        nd = arr.ndim
        return pl.BlockSpec(arr.shape, lambda b, _nd=nd: (0,) * _nd)

    weight_names = ["emb_ln_g", "emb_ln_b", "wqkv", "bqkv", "wo", "bo",
                    "ln1_g", "ln1_b", "w1", "b1", "w2", "b2",
                    "ln2_g", "ln2_b", "wp", "bp", "w_heads", "b_heads"]
    weights = [packed[n] for n in weight_names]

    in_specs = ([pl.BlockSpec((1, S, HIDDEN), lambda b: (b, 0, 0)),
                 pl.BlockSpec((1, 1, S), lambda b: (b, 0, 0))]
                + [full_spec(w) for w in weights])

    logits = pl.pallas_call(
        _dann_fused_kernel,
        out_shape=jax.ShapeDtypeStruct((B, 1, HEADS_OUT), jnp.float32),
        grid=(B,),
        in_specs=in_specs,
        out_specs=pl.BlockSpec((1, 1, HEADS_OUT), lambda b: (b, 0, 0)),
        compiler_params=pltpu.CompilerParams(
            dimension_semantics=("parallel",)),   # v7x: the 2 TCs split the batch
    )(emb, mask_bias, *weights)

    logits = logits.reshape(B, HEADS_OUT)
    task_out = logits[:, :NUM_LABELS]
    if not train_mode:
        return task_out
    # Matches the PyTorch module: task head consumes pooled[:16];
    # GradientReversal is identity in the forward pass.
    return task_out[:16], logits[:, NUM_LABELS:]


# ---------------------------------- main -------------------------------------
if __name__ == "__main__":
    key = jax.random.PRNGKey(0)
    k_param, k_ids = jax.random.split(key)

    params = init_params(k_param)
    packed = pack_params(params)

    B, S = 2, 8
    input_ids = jax.random.randint(k_ids, (B, S), 0, VOCAB, dtype=jnp.int32)
    attention_mask = jnp.ones((B, S), dtype=jnp.int32)

    task_out, domain_out = dann_forward(packed, input_ids, attention_mask,
                                        train_mode=True)
    jax.block_until_ready((task_out, domain_out))

    assert task_out.shape == (B, NUM_LABELS) and domain_out.shape == (B, 1)
    print("KERNEL_OK")
</pallas_src>

<mosaic_0001>
module attributes {stable_mosaic.version = 11 : i64} {
  func.func @_dann_fused_kernel(%arg0: i32, %arg1: memref<1x8x32xf32, #tpu.memory_space<vmem>>, %arg2: memref<1x1x8xf32, #tpu.memory_space<vmem>>, %arg3: memref<1x32xf32, #tpu.memory_space<vmem>>, %arg4: memref<1x32xf32, #tpu.memory_space<vmem>>, %arg5: memref<2x32x96xf32, #tpu.memory_space<vmem>>, %arg6: memref<2x1x96xf32, #tpu.memory_space<vmem>>, %arg7: memref<2x32x32xf32, #tpu.memory_space<vmem>>, %arg8: memref<2x1x32xf32, #tpu.memory_space<vmem>>, %arg9: memref<2x1x32xf32, #tpu.memory_space<vmem>>, %arg10: memref<2x1x32xf32, #tpu.memory_space<vmem>>, %arg11: memref<2x32x64xf32, #tpu.memory_space<vmem>>, %arg12: memref<2x1x64xf32, #tpu.memory_space<vmem>>, %arg13: memref<2x64x32xf32, #tpu.memory_space<vmem>>, %arg14: memref<2x1x32xf32, #tpu.memory_space<vmem>>, %arg15: memref<2x1x32xf32, #tpu.memory_space<vmem>>, %arg16: memref<2x1x32xf32, #tpu.memory_space<vmem>>, %arg17: memref<32x32xf32, #tpu.memory_space<vmem>>, %arg18: memref<1x32xf32, #tpu.memory_space<vmem>>, %arg19: memref<32x3xf32, #tpu.memory_space<vmem>>, %arg20: memref<1x3xf32, #tpu.memory_space<vmem>>, %arg21: memref<1x1x3xf32, #tpu.memory_space<vmem>>) attributes {dimension_semantics = [#tpu.dimension_semantics<parallel>], iteration_bounds = array<i64: 2>, scalar_prefetch = 0 : i64, scratch_operands = 0 : i64, tpu.core_type = #tpu.core_type<tc>, window_params = [{transform_indices = @transform_0, window_bounds = array<i64: 1, 8, 32>}, {transform_indices = @transform_1, window_bounds = array<i64: 1, 1, 8>}, {pipeline_mode = #tpu.pipeline_mode<synchronous>, transform_indices = @transform_2, window_bounds = array<i64: 1, 32>}, {pipeline_mode = #tpu.pipeline_mode<synchronous>, transform_indices = @transform_3, window_bounds = array<i64: 1, 32>}, {pipeline_mode = #tpu.pipeline_mode<synchronous>, transform_indices = @transform_4, window_bounds = array<i64: 2, 32, 96>}, {pipeline_mode = #tpu.pipeline_mode<synchronous>, transform_indices = @transform_5, window_bounds = array<i64: 2, 1, 96>}, {pipeline_mode = #tpu.pipeline_mode<synchronous>, transform_indices = @transform_6, window_bounds = array<i64: 2, 32, 32>}, {pipeline_mode = #tpu.pipeline_mode<synchronous>, transform_indices = @transform_7, window_bounds = array<i64: 2, 1, 32>}, {pipeline_mode = #tpu.pipeline_mode<synchronous>, transform_indices = @transform_8, window_bounds = array<i64: 2, 1, 32>}, {pipeline_mode = #tpu.pipeline_mode<synchronous>, transform_indices = @transform_9, window_bounds = array<i64: 2, 1, 32>}, {pipeline_mode = #tpu.pipeline_mode<synchronous>, transform_indices = @transform_10, window_bounds = array<i64: 2, 32, 64>}, {pipeline_mode = #tpu.pipeline_mode<synchronous>, transform_indices = @transform_11, window_bounds = array<i64: 2, 1, 64>}, {pipeline_mode = #tpu.pipeline_mode<synchronous>, transform_indices = @transform_12, window_bounds = array<i64: 2, 64, 32>}, {pipeline_mode = #tpu.pipeline_mode<synchronous>, transform_indices = @transform_13, window_bounds = array<i64: 2, 1, 32>}, {pipeline_mode = #tpu.pipeline_mode<synchronous>, transform_indices = @transform_14, window_bounds = array<i64: 2, 1, 32>}, {pipeline_mode = #tpu.pipeline_mode<synchronous>, transform_indices = @transform_15, window_bounds = array<i64: 2, 1, 32>}, {pipeline_mode = #tpu.pipeline_mode<synchronous>, transform_indices = @transform_16, window_bounds = array<i64: 32, 32>}, {pipeline_mode = #tpu.pipeline_mode<synchronous>, transform_indices = @transform_17, window_bounds = array<i64: 1, 32>}, {pipeline_mode = #tpu.pipeline_mode<synchronous>, transform_indices = @transform_18, window_bounds = array<i64: 32, 3>}, {pipeline_mode = #tpu.pipeline_mode<synchronous>, transform_indices = @transform_19, window_bounds = array<i64: 1, 3>}, {transform_indices = @transform_20, window_bounds = array<i64: 1, 1, 3>}]} {
    %c0 = arith.constant 0 : index
    %c0_0 = arith.constant 0 : index
    %c0_1 = arith.constant 0 : index
    %0 = vector.load %arg1[%c0, %c0_0, %c0_1] : memref<1x8x32xf32, #tpu.memory_space<vmem>>, vector<1x8x32xf32>
    %1 = vector.shape_cast %0 : vector<1x8x32xf32> to vector<8x32xf32>
    %c0_2 = arith.constant 0 : index
    %c0_3 = arith.constant 0 : index
    %c0_4 = arith.constant 0 : index
    %2 = vector.load %arg2[%c0_2, %c0_3, %c0_4] : memref<1x1x8xf32, #tpu.memory_space<vmem>>, vector<1x1x8xf32>
    %3 = vector.shape_cast %2 : vector<1x1x8xf32> to vector<1x8xf32>
    %c0_5 = arith.constant 0 : index
    %c0_6 = arith.constant 0 : index
    %4 = vector.load %arg3[%c0_5, %c0_6] : memref<1x32xf32, #tpu.memory_space<vmem>>, vector<1x32xf32>
    %c0_7 = arith.constant 0 : index
    %c0_8 = arith.constant 0 : index
    %5 = vector.load %arg4[%c0_7, %c0_8] : memref<1x32xf32, #tpu.memory_space<vmem>>, vector<1x32xf32>
    %cst = arith.constant dense<0.000000e+00> : vector<8xf32>
    %6 = vector.multi_reduction <add>, %1, %cst [1] : vector<8x32xf32> to vector<8xf32>
    %7 = vector.shape_cast %6 : vector<8xf32> to vector<8x1xf32>
    %cst_9 = arith.constant 3.200000e+01 : f32
    %8 = vector.broadcast %cst_9 : f32 to vector<8x1xf32>
    %9 = arith.divf %7, %8 : vector<8x1xf32>
    %10 = vector.broadcast %9 : vector<8x1xf32> to vector<8x32xf32>
    %11 = arith.subf %1, %10 : vector<8x32xf32>
    %12 = vector.broadcast %9 : vector<8x1xf32> to vector<8x32xf32>
    %13 = arith.subf %1, %12 : vector<8x32xf32>
    %14 = arith.mulf %11, %13 : vector<8x32xf32>
    %cst_10 = arith.constant dense<0.000000e+00> : vector<8xf32>
    %15 = vector.multi_reduction <add>, %14, %cst_10 [1] : vector<8x32xf32> to vector<8xf32>
    %16 = vector.shape_cast %15 : vector<8xf32> to vector<8x1xf32>
    %cst_11 = arith.constant 3.200000e+01 : f32
    %17 = vector.broadcast %cst_11 : f32 to vector<8x1xf32>
    %18 = arith.divf %16, %17 : vector<8x1xf32>
    %19 = vector.broadcast %9 : vector<8x1xf32> to vector<8x32xf32>
    %20 = arith.subf %1, %19 : vector<8x32xf32>
    %cst_12 = arith.constant 9.99999996E-13 : f32
    %21 = vector.broadcast %cst_12 : f32 to vector<8x1xf32>
    %22 = arith.addf %18, %21 : vector<8x1xf32>
    %23 = math.rsqrt %22 : vector<8x1xf32>
    %24 = vector.broadcast %23 : vector<8x1xf32> to vector<8x32xf32>
    %25 = arith.mulf %20, %24 : vector<8x32xf32>
    %26 = vector.broadcast %4 : vector<1x32xf32> to vector<8x32xf32>
    %27 = arith.mulf %25, %26 : vector<8x32xf32>
    %28 = vector.broadcast %5 : vector<1x32xf32> to vector<8x32xf32>
    %29 = arith.addf %27, %28 : vector<8x32xf32>
    %c0_13 = arith.constant 0 : index
    %c0_14 = arith.constant 0 : index
    %c0_15 = arith.constant 0 : index
    %30 = vector.load %arg5[%c0_13, %c0_14, %c0_15] : memref<2x32x96xf32, #tpu.memory_space<vmem>>, vector<1x32x96xf32>
    %31 = vector.shape_cast %30 : vector<1x32x96xf32> to vector<32x96xf32>
    %cst_16 = arith.constant dense<0.000000e+00> : vector<8x96xf32>
    %32 = tpu.matmul %29, %31, %cst_16 {dimension_numbers = #tpu.dot_dimension_numbers<[1], [0], [0], [1], [0, 0, 1, 1], [], []>} : vector<8x32xf32>, vector<32x96xf32>, vector<8x96xf32> -> vector<8x96xf32>
    %c0_17 = arith.constant 0 : index
    %c0_18 = arith.constant 0 : index
    %c0_19 = arith.constant 0 : index
    %33 = vector.load %arg6[%c0_17, %c0_18, %c0_19] : memref<2x1x96xf32, #tpu.memory_space<vmem>>, vector<1x1x96xf32>
    %34 = vector.shape_cast %33 : vector<1x1x96xf32> to vector<1x96xf32>
    %35 = vector.broadcast %34 : vector<1x96xf32> to vector<8x96xf32>
    %36 = arith.addf %32, %35 : vector<8x96xf32>
    %c0_20 = arith.constant 0 : index
    %c0_21 = arith.constant 0 : index
    %c0_22 = arith.constant 0 : index
    %37 = vector.load %arg7[%c0_20, %c0_21, %c0_22] : memref<2x32x32xf32, #tpu.memory_space<vmem>>, vector<1x32x32xf32>
    %38 = vector.shape_cast %37 : vector<1x32x32xf32> to vector<32x32xf32>
    %c0_23 = arith.constant 0 : index
    %c0_24 = arith.constant 0 : index
    %c0_25 = arith.constant 0 : index
    %39 = vector.load %arg8[%c0_23, %c0_24, %c0_25] : memref<2x1x32xf32, #tpu.memory_space<vmem>>, vector<1x1x32xf32>
    %40 = vector.shape_cast %39 : vector<1x1x32xf32> to vector<1x32xf32>
    %41 = vector.extract_strided_slice %36 {offsets = [0, 0], sizes = [8, 16], strides = [1, 1]} : vector<8x96xf32> to vector<8x16xf32>
    %42 = vector.extract_strided_slice %36 {offsets = [0, 32], sizes = [8, 16], strides = [1, 1]} : vector<8x96xf32> to vector<8x16xf32>
    %43 = vector.extract_strided_slice %36 {offsets = [0, 64], sizes = [8, 16], strides = [1, 1]} : vector<8x96xf32> to vector<8x16xf32>
    %cst_26 = arith.constant dense<0.000000e+00> : vector<8x8xf32>
    %44 = tpu.matmul %41, %42, %cst_26 {dimension_numbers = #tpu.dot_dimension_numbers<[1], [1], [0], [0], [0, 0, 1, 0], [], []>} : vector<8x16xf32>, vector<8x16xf32>, vector<8x8xf32> -> vector<8x8xf32>
    %45 = vector.broadcast %3 : vector<1x8xf32> to vector<8x8xf32>
    %46 = arith.addf %44, %45 : vector<8x8xf32>
    %cst_27 = arith.constant dense<0xFF800000> : vector<8xf32>
    %47 = vector.multi_reduction <maximumf>, %46, %cst_27 [1] : vector<8x8xf32> to vector<8xf32>
    %48 = vector.shape_cast %47 : vector<8xf32> to vector<8x1xf32>
    %49 = vector.broadcast %48 : vector<8x1xf32> to vector<8x8xf32>
    %50 = arith.subf %46, %49 : vector<8x8xf32>
    %51 = math.exp %50 : vector<8x8xf32>
    %cst_28 = arith.constant dense<0.000000e+00> : vector<8xf32>
    %52 = vector.multi_reduction <add>, %51, %cst_28 [1] : vector<8x8xf32> to vector<8xf32>
    %53 = vector.shape_cast %52 : vector<8xf32> to vector<8x1xf32>
    %54 = tpu.reciprocal %53 {approx = true} : vector<8x1xf32> -> vector<8x1xf32>
    %55 = vector.broadcast %54 : vector<8x1xf32> to vector<8x8xf32>
    %56 = arith.mulf %51, %55 : vector<8x8xf32>
    %cst_29 = arith.constant dense<0.000000e+00> : vector<8x16xf32>
    %57 = tpu.matmul %56, %43, %cst_29 {dimension_numbers = #tpu.dot_dimension_numbers<[1], [0], [0], [1], [0, 0, 1, 1], [], []>} : vector<8x8xf32>, vector<8x16xf32>, vector<8x16xf32> -> vector<8x16xf32>
    %58 = vector.extract_strided_slice %38 {offsets = [0, 0], sizes = [16, 32], strides = [1, 1]} : vector<32x32xf32> to vector<16x32xf32>
    %cst_30 = arith.constant dense<0.000000e+00> : vector<8x32xf32>
    %59 = tpu.matmul %57, %58, %cst_30 {dimension_numbers = #tpu.dot_dimension_numbers<[1], [0], [0], [1], [0, 0, 1, 1], [], []>} : vector<8x16xf32>, vector<16x32xf32>, vector<8x32xf32> -> vector<8x32xf32>
    %60 = vector.broadcast %40 : vector<1x32xf32> to vector<8x32xf32>
    %61 = arith.addf %60, %59 : vector<8x32xf32>
    %62 = vector.extract_strided_slice %36 {offsets = [0, 16], sizes = [8, 16], strides = [1, 1]} : vector<8x96xf32> to vector<8x16xf32>
    %63 = vector.extract_strided_slice %36 {offsets = [0, 48], sizes = [8, 16], strides = [1, 1]} : vector<8x96xf32> to vector<8x16xf32>
    %64 = vector.extract_strided_slice %36 {offsets = [0, 80], sizes = [8, 16], strides = [1, 1]} : vector<8x96xf32> to vector<8x16xf32>
    %cst_31 = arith.constant dense<0.000000e+00> : vector<8x8xf32>
    %65 = tpu.matmul %62, %63, %cst_31 {dimension_numbers = #tpu.dot_dimension_numbers<[1], [1], [0], [0], [0, 0, 1, 0], [], []>} : vector<8x16xf32>, vector<8x16xf32>, vector<8x8xf32> -> vector<8x8xf32>
    %66 = vector.broadcast %3 : vector<1x8xf32> to vector<8x8xf32>
    %67 = arith.addf %65, %66 : vector<8x8xf32>
    %cst_32 = arith.constant dense<0xFF800000> : vector<8xf32>
    %68 = vector.multi_reduction <maximumf>, %67, %cst_32 [1] : vector<8x8xf32> to vector<8xf32>
    %69 = vector.shape_cast %68 : vector<8xf32> to vector<8x1xf32>
    %70 = vector.broadcast %69 : vector<8x1xf32> to vector<8x8xf32>
    %71 = arith.subf %67, %70 : vector<8x8xf32>
    %72 = math.exp %71 : vector<8x8xf32>
    %cst_33 = arith.constant dense<0.000000e+00> : vector<8xf32>
    %73 = vector.multi_reduction <add>, %72, %cst_33 [1] : vector<8x8xf32> to vector<8xf32>
    %74 = vector.shape_cast %73 : vector<8xf32> to vector<8x1xf32>
    %75 = tpu.reciprocal %74 {approx = true} : vector<8x1xf32> -> vector<8x1xf32>
    %76 = vector.broadcast %75 : vector<8x1xf32> to vector<8x8xf32>
    %77 = arith.mulf %72, %76 : vector<8x8xf32>
    %cst_34 = arith.constant dense<0.000000e+00> : vector<8x16xf32>
    %78 = tpu.matmul %77, %64, %cst_34 {dimension_numbers = #tpu.dot_dimension_numbers<[1], [0], [0], [1], [0, 0, 1, 1], [], []>} : vector<8x8xf32>, vector<8x16xf32>, vector<8x16xf32> -> vector<8x16xf32>
    %79 = vector.extract_strided_slice %38 {offsets = [16, 0], sizes = [16, 32], strides = [1, 1]} : vector<32x32xf32> to vector<16x32xf32>
    %cst_35 = arith.constant dense<0.000000e+00> : vector<8x32xf32>
    %80 = tpu.matmul %78, %79, %cst_35 {dimension_numbers = #tpu.dot_dimension_numbers<[1], [0], [0], [1], [0, 0, 1, 1], [], []>} : vector<8x16xf32>, vector<16x32xf32>, vector<8x32xf32> -> vector<8x32xf32>
    %81 = arith.addf %61, %80 : vector<8x32xf32>
    %82 = arith.addf %81, %29 : vector<8x32xf32>
    %c0_36 = arith.constant 0 : index
    %c0_37 = arith.constant 0 : index
    %c0_38 = arith.constant 0 : index
    %83 = vector.load %arg9[%c0_36, %c0_37, %c0_38] : memref<2x1x32xf32, #tpu.memory_space<vmem>>, vector<1x1x32xf32>
    %84 = vector.shape_cast %83 : vector<1x1x32xf32> to vector<1x32xf32>
    %c0_39 = arith.constant 0 : index
    %c0_40 = arith.constant 0 : index
    %c0_41 = arith.constant 0 : index
    %85 = vector.load %arg10[%c0_39, %c0_40, %c0_41] : memref<2x1x32xf32, #tpu.memory_space<vmem>>, vector<1x1x32xf32>
    %86 = vector.shape_cast %85 : vector<1x1x32xf32> to vector<1x32xf32>
    %cst_42 = arith.constant dense<0.000000e+00> : vector<8xf32>
    %87 = vector.multi_reduction <add>, %82, %cst_42 [1] : vector<8x32xf32> to vector<8xf32>
    %88 = vector.shape_cast %87 : vector<8xf32> to vector<8x1xf32>
    %cst_43 = arith.constant 3.200000e+01 : f32
    %89 = vector.broadcast %cst_43 : f32 to vector<8x1xf32>
    %90 = arith.divf %88, %89 : vector<8x1xf32>
    %91 = vector.broadcast %90 : vector<8x1xf32> to vector<8x32xf32>
    %92 = arith.subf %82, %91 : vector<8x32xf32>
    %93 = vector.broadcast %90 : vector<8x1xf32> to vector<8x32xf32>
    %94 = arith.subf %82, %93 : vector<8x32xf32>
    %95 = arith.mulf %92, %94 : vector<8x32xf32>
    %cst_44 = arith.constant dense<0.000000e+00> : vector<8xf32>
    %96 = vector.multi_reduction <add>, %95, %cst_44 [1] : vector<8x32xf32> to vector<8xf32>
    %97 = vector.shape_cast %96 : vector<8xf32> to vector<8x1xf32>
    %cst_45 = arith.constant 3.200000e+01 : f32
    %98 = vector.broadcast %cst_45 : f32 to vector<8x1xf32>
    %99 = arith.divf %97, %98 : vector<8x1xf32>
    %100 = vector.broadcast %90 : vector<8x1xf32> to vector<8x32xf32>
    %101 = arith.subf %82, %100 : vector<8x32xf32>
    %cst_46 = arith.constant 9.99999996E-13 : f32
    %102 = vector.broadcast %cst_46 : f32 to vector<8x1xf32>
    %103 = arith.addf %99, %102 : vector<8x1xf32>
    %104 = math.rsqrt %103 : vector<8x1xf32>
    %105 = vector.broadcast %104 : vector<8x1xf32> to vector<8x32xf32>
    %106 = arith.mulf %101, %105 : vector<8x32xf32>
    %107 = vector.broadcast %84 : vector<1x32xf32> to vector<8x32xf32>
    %108 = arith.mulf %106, %107 : vector<8x32xf32>
    %109 = vector.broadcast %86 : vector<1x32xf32> to vector<8x32xf32>
    %110 = arith.addf %108, %109 : vector<8x32xf32>
    %c0_47 = arith.constant 0 : index
    %c0_48 = arith.constant 0 : index
    %c0_49 = arith.constant 0 : index
    %111 = vector.load %arg11[%c0_47, %c0_48, %c0_49] : memref<2x32x64xf32, #tpu.memory_space<vmem>>, vector<1x32x64xf32>
    %112 = vector.shape_cast %111 : vector<1x32x64xf32> to vector<32x64xf32>
    %cst_50 = arith.constant dense<0.000000e+00> : vector<8x64xf32>
    %113 = tpu.matmul %110, %112, %cst_50 {dimension_numbers = #tpu.dot_dimension_numbers<[1], [0], [0], [1], [0, 0, 1, 1], [], []>} : vector<8x32xf32>, vector<32x64xf32>, vector<8x64xf32> -> vector<8x64xf32>
    %c0_51 = arith.constant 0 : index
    %c0_52 = arith.constant 0 : index
    %c0_53 = arith.constant 0 : index
    %114 = vector.load %arg12[%c0_51, %c0_52, %c0_53] : memref<2x1x64xf32, #tpu.memory_space<vmem>>, vector<1x1x64xf32>
    %115 = vector.shape_cast %114 : vector<1x1x64xf32> to vector<1x64xf32>
    %116 = vector.broadcast %115 : vector<1x64xf32> to vector<8x64xf32>
    %117 = arith.addf %113, %116 : vector<8x64xf32>
    %cst_54 = arith.constant 5.000000e-01 : f32
    %118 = vector.broadcast %cst_54 : f32 to vector<8x64xf32>
    %119 = arith.mulf %118, %117 : vector<8x64xf32>
    %cst_55 = arith.constant 0.707106769 : f32
    %120 = vector.broadcast %cst_55 : f32 to vector<8x64xf32>
    %121 = arith.mulf %117, %120 : vector<8x64xf32>
    %122 = math.erf %121 : vector<8x64xf32>
    %cst_56 = arith.constant 1.000000e+00 : f32
    %123 = vector.broadcast %cst_56 : f32 to vector<8x64xf32>
    %124 = arith.addf %123, %122 : vector<8x64xf32>
    %125 = arith.mulf %119, %124 : vector<8x64xf32>
    %c0_57 = arith.constant 0 : index
    %c0_58 = arith.constant 0 : index
    %c0_59 = arith.constant 0 : index
    %126 = vector.load %arg13[%c0_57, %c0_58, %c0_59] : memref<2x64x32xf32, #tpu.memory_space<vmem>>, vector<1x64x32xf32>
    %127 = vector.shape_cast %126 : vector<1x64x32xf32> to vector<64x32xf32>
    %cst_60 = arith.constant dense<0.000000e+00> : vector<8x32xf32>
    %128 = tpu.matmul %125, %127, %cst_60 {dimension_numbers = #tpu.dot_dimension_numbers<[1], [0], [0], [1], [0, 0, 1, 1], [], []>} : vector<8x64xf32>, vector<64x32xf32>, vector<8x32xf32> -> vector<8x32xf32>
    %c0_61 = arith.constant 0 : index
    %c0_62 = arith.constant 0 : index
    %c0_63 = arith.constant 0 : index
    %129 = vector.load %arg14[%c0_61, %c0_62, %c0_63] : memref<2x1x32xf32, #tpu.memory_space<vmem>>, vector<1x1x32xf32>
    %130 = vector.shape_cast %129 : vector<1x1x32xf32> to vector<1x32xf32>
    %131 = vector.broadcast %130 : vector<1x32xf32> to vector<8x32xf32>
    %132 = arith.addf %128, %131 : vector<8x32xf32>
    %133 = arith.addf %132, %110 : vector<8x32xf32>
    %c0_64 = arith.constant 0 : index
    %c0_65 = arith.constant 0 : index
    %c0_66 = arith.constant 0 : index
    %134 = vector.load %arg15[%c0_64, %c0_65, %c0_66] : memref<2x1x32xf32, #tpu.memory_space<vmem>>, vector<1x1x32xf32>
    %135 = vector.shape_cast %134 : vector<1x1x32xf32> to vector<1x32xf32>
    %c0_67 = arith.constant 0 : index
    %c0_68 = arith.constant 0 : index
    %c0_69 = arith.constant 0 : index
    %136 = vector.load %arg16[%c0_67, %c0_68, %c0_69] : memref<2x1x32xf32, #tpu.memory_space<vmem>>, vector<1x1x32xf32>
    %137 = vector.shape_cast %136 : vector<1x1x32xf32> to vector<1x32xf32>
    %cst_70 = arith.constant dense<0.000000e+00> : vector<8xf32>
    %138 = vector.multi_reduction <add>, %133, %cst_70 [1] : vector<8x32xf32> to vector<8xf32>
    %139 = vector.shape_cast %138 : vector<8xf32> to vector<8x1xf32>
    %cst_71 = arith.constant 3.200000e+01 : f32
    %140 = vector.broadcast %cst_71 : f32 to vector<8x1xf32>
    %141 = arith.divf %139, %140 : vector<8x1xf32>
    %142 = vector.broadcast %141 : vector<8x1xf32> to vector<8x32xf32>
    %143 = arith.subf %133, %142 : vector<8x32xf32>
    %144 = vector.broadcast %141 : vector<8x1xf32> to vector<8x32xf32>
    %145 = arith.subf %133, %144 : vector<8x32xf32>
    %146 = arith.mulf %143, %145 : vector<8x32xf32>
    %cst_72 = arith.constant dense<0.000000e+00> : vector<8xf32>
    %147 = vector.multi_reduction <add>, %146, %cst_72 [1] : vector<8x32xf32> to vector<8xf32>
    %148 = vector.shape_cast %147 : vector<8xf32> to vector<8x1xf32>
    %cst_73 = arith.constant 3.200000e+01 : f32
    %149 = vector.broadcast %cst_73 : f32 to vector<8x1xf32>
    %150 = arith.divf %148, %149 : vector<8x1xf32>
    %151 = vector.broadcast %141 : vector<8x1xf32> to vector<8x32xf32>
    %152 = arith.subf %133, %151 : vector<8x32xf32>
    %cst_74 = arith.constant 9.99999996E-13 : f32
    %153 = vector.broadcast %cst_74 : f32 to vector<8x1xf32>
    %154 = arith.addf %150, %153 : vector<8x1xf32>
    %155 = math.rsqrt %154 : vector<8x1xf32>
    %156 = vector.broadcast %155 : vector<8x1xf32> to vector<8x32xf32>
    %157 = arith.mulf %152, %156 : vector<8x32xf32>
    %158 = vector.broadcast %135 : vector<1x32xf32> to vector<8x32xf32>
    %159 = arith.mulf %157, %158 : vector<8x32xf32>
    %160 = vector.broadcast %137 : vector<1x32xf32> to vector<8x32xf32>
    %161 = arith.addf %159, %160 : vector<8x32xf32>
    %c1 = arith.constant 1 : index
    %c0_75 = arith.constant 0 : index
    %c0_76 = arith.constant 0 : index
    %162 = vector.load %arg5[%c1, %c0_75, %c0_76] : memref<2x32x96xf32, #tpu.memory_space<vmem>>, vector<1x32x96xf32>
    %163 = vector.shape_cast %162 : vector<1x32x96xf32> to vector<32x96xf32>
    %cst_77 = arith.constant dense<0.000000e+00> : vector<8x96xf32>
    %164 = tpu.matmul %161, %163, %cst_77 {dimension_numbers = #tpu.dot_dimension_numbers<[1], [0], [0], [1], [0, 0, 1, 1], [], []>} : vector<8x32xf32>, vector<32x96xf32>, vector<8x96xf32> -> vector<8x96xf32>
    %c1_78 = arith.constant 1 : index
    %c0_79 = arith.constant 0 : index
    %c0_80 = arith.constant 0 : index
    %165 = vector.load %arg6[%c1_78, %c0_79, %c0_80] : memref<2x1x96xf32, #tpu.memory_space<vmem>>, vector<1x1x96xf32>
    %166 = vector.shape_cast %165 : vector<1x1x96xf32> to vector<1x96xf32>
    %167 = vector.broadcast %166 : vector<1x96xf32> to vector<8x96xf32>
    %168 = arith.addf %164, %167 : vector<8x96xf32>
    %c1_81 = arith.constant 1 : index
    %c0_82 = arith.constant 0 : index
    %c0_83 = arith.constant 0 : index
    %169 = vector.load %arg7[%c1_81, %c0_82, %c0_83] : memref<2x32x32xf32, #tpu.memory_space<vmem>>, vector<1x32x32xf32>
    %170 = vector.shape_cast %169 : vector<1x32x32xf32> to vector<32x32xf32>
    %c1_84 = arith.constant 1 : index
    %c0_85 = arith.constant 0 : index
    %c0_86 = arith.constant 0 : index
    %171 = vector.load %arg8[%c1_84, %c0_85, %c0_86] : memref<2x1x32xf32, #tpu.memory_space<vmem>>, vector<1x1x32xf32>
    %172 = vector.shape_cast %171 : vector<1x1x32xf32> to vector<1x32xf32>
    %173 = vector.extract_strided_slice %168 {offsets = [0, 0], sizes = [8, 16], strides = [1, 1]} : vector<8x96xf32> to vector<8x16xf32>
    %174 = vector.extract_strided_slice %168 {offsets = [0, 32], sizes = [8, 16], strides = [1, 1]} : vector<8x96xf32> to vector<8x16xf32>
    %175 = vector.extract_strided_slice %168 {offsets = [0, 64], sizes = [8, 16], strides = [1, 1]} : vector<8x96xf32> to vector<8x16xf32>
    %cst_87 = arith.constant dense<0.000000e+00> : vector<8x8xf32>
    %176 = tpu.matmul %173, %174, %cst_87 {dimension_numbers = #tpu.dot_dimension_numbers<[1], [1], [0], [0], [0, 0, 1, 0], [], []>} : vector<8x16xf32>, vector<8x16xf32>, vector<8x8xf32> -> vector<8x8xf32>
    %177 = vector.broadcast %3 : vector<1x8xf32> to vector<8x8xf32>
    %178 = arith.addf %176, %177 : vector<8x8xf32>
    %cst_88 = arith.constant dense<0xFF800000> : vector<8xf32>
    %179 = vector.multi_reduction <maximumf>, %178, %cst_88 [1] : vector<8x8xf32> to vector<8xf32>
    %180 = vector.shape_cast %179 : vector<8xf32> to vector<8x1xf32>
    %181 = vector.broadcast %180 : vector<8x1xf32> to vector<8x8xf32>
    %182 = arith.subf %178, %181 : vector<8x8xf32>
    %183 = math.exp %182 : vector<8x8xf32>
    %cst_89 = arith.constant dense<0.000000e+00> : vector<8xf32>
    %184 = vector.multi_reduction <add>, %183, %cst_89 [1] : vector<8x8xf32> to vector<8xf32>
    %185 = vector.shape_cast %184 : vector<8xf32> to vector<8x1xf32>
    %186 = tpu.reciprocal %185 {approx = true} : vector<8x1xf32> -> vector<8x1xf32>
    %187 = vector.broadcast %186 : vector<8x1xf32> to vector<8x8xf32>
    %188 = arith.mulf %183, %187 : vector<8x8xf32>
    %cst_90 = arith.constant dense<0.000000e+00> : vector<8x16xf32>
    %189 = tpu.matmul %188, %175, %cst_90 {dimension_numbers = #tpu.dot_dimension_numbers<[1], [0], [0], [1], [0, 0, 1, 1], [], []>} : vector<8x8xf32>, vector<8x16xf32>, vector<8x16xf32> -> vector<8x16xf32>
    %190 = vector.extract_strided_slice %170 {offsets = [0, 0], sizes = [16, 32], strides = [1, 1]} : vector<32x32xf32> to vector<16x32xf32>
    %cst_91 = arith.constant dense<0.000000e+00> : vector<8x32xf32>
    %191 = tpu.matmul %189, %190, %cst_91 {dimension_numbers = #tpu.dot_dimension_numbers<[1], [0], [0], [1], [0, 0, 1, 1], [], []>} : vector<8x16xf32>, vector<16x32xf32>, vector<8x32xf32> -> vector<8x32xf32>
    %192 = vector.broadcast %172 : vector<1x32xf32> to vector<8x32xf32>
    %193 = arith.addf %192, %191 : vector<8x32xf32>
    %194 = vector.extract_strided_slice %168 {offsets = [0, 16], sizes = [8, 16], strides = [1, 1]} : vector<8x96xf32> to vector<8x16xf32>
    %195 = vector.extract_strided_slice %168 {offsets = [0, 48], sizes = [8, 16], strides = [1, 1]} : vector<8x96xf32> to vector<8x16xf32>
    %196 = vector.extract_strided_slice %168 {offsets = [0, 80], sizes = [8, 16], strides = [1, 1]} : vector<8x96xf32> to vector<8x16xf32>
    %cst_92 = arith.constant dense<0.000000e+00> : vector<8x8xf32>
    %197 = tpu.matmul %194, %195, %cst_92 {dimension_numbers = #tpu.dot_dimension_numbers<[1], [1], [0], [0], [0, 0, 1, 0], [], []>} : vector<8x16xf32>, vector<8x16xf32>, vector<8x8xf32> -> vector<8x8xf32>
    %198 = vector.broadcast %3 : vector<1x8xf32> to vector<8x8xf32>
    %199 = arith.addf %197, %198 : vector<8x8xf32>
    %cst_93 = arith.constant dense<0xFF800000> : vector<8xf32>
    %200 = vector.multi_reduction <maximumf>, %199, %cst_93 [1] : vector<8x8xf32> to vector<8xf32>
    %201 = vector.shape_cast %200 : vector<8xf32> to vector<8x1xf32>
    %202 = vector.broadcast %201 : vector<8x1xf32> to vector<8x8xf32>
    %203 = arith.subf %199, %202 : vector<8x8xf32>
    %204 = math.exp %203 : vector<8x8xf32>
    %cst_94 = arith.constant dense<0.000000e+00> : vector<8xf32>
    %205 = vector.multi_reduction <add>, %204, %cst_94 [1] : vector<8x8xf32> to vector<8xf32>
    %206 = vector.shape_cast %205 : vector<8xf32> to vector<8x1xf32>
    %207 = tpu.reciprocal %206 {approx = true} : vector<8x1xf32> -> vector<8x1xf32>
    %208 = vector.broadcast %207 : vector<8x1xf32> to vector<8x8xf32>
    %209 = arith.mulf %204, %208 : vector<8x8xf32>
    %cst_95 = arith.constant dense<0.000000e+00> : vector<8x16xf32>
    %210 = tpu.matmul %209, %196, %cst_95 {dimension_numbers = #tpu.dot_dimension_numbers<[1], [0], [0], [1], [0, 0, 1, 1], [], []>} : vector<8x8xf32>, vector<8x16xf32>, vector<8x16xf32> -> vector<8x16xf32>
    %211 = vector.extract_strided_slice %170 {offsets = [16, 0], sizes = [16, 32], strides = [1, 1]} : vector<32x32xf32> to vector<16x32xf32>
    %cst_96 = arith.constant dense<0.000000e+00> : vector<8x32xf32>
    %212 = tpu.matmul %210, %211, %cst_96 {dimension_numbers = #tpu.dot_dimension_numbers<[1], [0], [0], [1], [0, 0, 1, 1], [], []>} : vector<8x16xf32>, vector<16x32xf32>, vector<8x32xf32> -> vector<8x32xf32>
    %213 = arith.addf %193, %212 : vector<8x32xf32>
    %214 = arith.addf %213, %161 : vector<8x32xf32>
    %c1_97 = arith.constant 1 : index
    %c0_98 = arith.constant 0 : index
    %c0_99 = arith.constant 0 : index
    %215 = vector.load %arg9[%c1_97, %c0_98, %c0_99] : memref<2x1x32xf32, #tpu.memory_space<vmem>>, vector<1x1x32xf32>
    %216 = vector.shape_cast %215 : vector<1x1x32xf32> to vector<1x32xf32>
    %c1_100 = arith.constant 1 : index
    %c0_101 = arith.constant 0 : index
    %c0_102 = arith.constant 0 : index
    %217 = vector.load %arg10[%c1_100, %c0_101, %c0_102] : memref<2x1x32xf32, #tpu.memory_space<vmem>>, vector<1x1x32xf32>
    %218 = vector.shape_cast %217 : vector<1x1x32xf32> to vector<1x32xf32>
    %cst_103 = arith.constant dense<0.000000e+00> : vector<8xf32>
    %219 = vector.multi_reduction <add>, %214, %cst_103 [1] : vector<8x32xf32> to vector<8xf32>
    %220 = vector.shape_cast %219 : vector<8xf32> to vector<8x1xf32>
    %cst_104 = arith.constant 3.200000e+01 : f32
    %221 = vector.broadcast %cst_104 : f32 to vector<8x1xf32>
    %222 = arith.divf %220, %221 : vector<8x1xf32>
    %223 = vector.broadcast %222 : vector<8x1xf32> to vector<8x32xf32>
    %224 = arith.subf %214, %223 : vector<8x32xf32>
    %225 = vector.broadcast %222 : vector<8x1xf32> to vector<8x32xf32>
    %226 = arith.subf %214, %225 : vector<8x32xf32>
    %227 = arith.mulf %224, %226 : vector<8x32xf32>
    %cst_105 = arith.constant dense<0.000000e+00> : vector<8xf32>
    %228 = vector.multi_reduction <add>, %227, %cst_105 [1] : vector<8x32xf32> to vector<8xf32>
    %229 = vector.shape_cast %228 : vector<8xf32> to vector<8x1xf32>
    %cst_106 = arith.constant 3.200000e+01 : f32
    %230 = vector.broadcast %cst_106 : f32 to vector<8x1xf32>
    %231 = arith.divf %229, %230 : vector<8x1xf32>
    %232 = vector.broadcast %222 : vector<8x1xf32> to vector<8x32xf32>
    %233 = arith.subf %214, %232 : vector<8x32xf32>
    %cst_107 = arith.constant 9.99999996E-13 : f32
    %234 = vector.broadcast %cst_107 : f32 to vector<8x1xf32>
    %235 = arith.addf %231, %234 : vector<8x1xf32>
    %236 = math.rsqrt %235 : vector<8x1xf32>
    %237 = vector.broadcast %236 : vector<8x1xf32> to vector<8x32xf32>
    %238 = arith.mulf %233, %237 : vector<8x32xf32>
    %239 = vector.broadcast %216 : vector<1x32xf32> to vector<8x32xf32>
    %240 = arith.mulf %238, %239 : vector<8x32xf32>
    %241 = vector.broadcast %218 : vector<1x32xf32> to vector<8x32xf32>
    %242 = arith.addf %240, %241 : vector<8x32xf32>
    %c1_108 = arith.constant 1 : index
    %c0_109 = arith.constant 0 : index
    %c0_110 = arith.constant 0 : index
    %243 = vector.load %arg11[%c1_108, %c0_109, %c0_110] : memref<2x32x64xf32, #tpu.memory_space<vmem>>, vector<1x32x64xf32>
    %244 = vector.shape_cast %243 : vector<1x32x64xf32> to vector<32x64xf32>
    %cst_111 = arith.constant dense<0.000000e+00> : vector<8x64xf32>
    %245 = tpu.matmul %242, %244, %cst_111 {dimension_numbers = #tpu.dot_dimension_numbers<[1], [0], [0], [1], [0, 0, 1, 1], [], []>} : vector<8x32xf32>, vector<32x64xf32>, vector<8x64xf32> -> vector<8x64xf32>
    %c1_112 = arith.constant 1 : index
    %c0_113 = arith.constant 0 : index
    %c0_114 = arith.constant 0 : index
    %246 = vector.load %arg12[%c1_112, %c0_113, %c0_114] : memref<2x1x64xf32, #tpu.memory_space<vmem>>, vector<1x1x64xf32>
    %247 = vector.shape_cast %246 : vector<1x1x64xf32> to vector<1x64xf32>
    %248 = vector.broadcast %247 : vector<1x64xf32> to vector<8x64xf32>
    %249 = arith.addf %245, %248 : vector<8x64xf32>
    %cst_115 = arith.constant 5.000000e-01 : f32
    %250 = vector.broadcast %cst_115 : f32 to vector<8x64xf32>
    %251 = arith.mulf %250, %249 : vector<8x64xf32>
    %cst_116 = arith.constant 0.707106769 : f32
    %252 = vector.broadcast %cst_116 : f32 to vector<8x64xf32>
    %253 = arith.mulf %249, %252 : vector<8x64xf32>
    %254 = math.erf %253 : vector<8x64xf32>
    %cst_117 = arith.constant 1.000000e+00 : f32
    %255 = vector.broadcast %cst_117 : f32 to vector<8x64xf32>
    %256 = arith.addf %255, %254 : vector<8x64xf32>
    %257 = arith.mulf %251, %256 : vector<8x64xf32>
    %c1_118 = arith.constant 1 : index
    %c0_119 = arith.constant 0 : index
    %c0_120 = arith.constant 0 : index
    %258 = vector.load %arg13[%c1_118, %c0_119, %c0_120] : memref<2x64x32xf32, #tpu.memory_space<vmem>>, vector<1x64x32xf32>
    %259 = vector.shape_cast %258 : vector<1x64x32xf32> to vector<64x32xf32>
    %cst_121 = arith.constant dense<0.000000e+00> : vector<8x32xf32>
    %260 = tpu.matmul %257, %259, %cst_121 {dimension_numbers = #tpu.dot_dimension_numbers<[1], [0], [0], [1], [0, 0, 1, 1], [], []>} : vector<8x64xf32>, vector<64x32xf32>, vector<8x32xf32> -> vector<8x32xf32>
    %c1_122 = arith.constant 1 : index
    %c0_123 = arith.constant 0 : index
    %c0_124 = arith.constant 0 : index
    %261 = vector.load %arg14[%c1_122, %c0_123, %c0_124] : memref<2x1x32xf32, #tpu.memory_space<vmem>>, vector<1x1x32xf32>
    %262 = vector.shape_cast %261 : vector<1x1x32xf32> to vector<1x32xf32>
    %263 = vector.broadcast %262 : vector<1x32xf32> to vector<8x32xf32>
    %264 = arith.addf %260, %263 : vector<8x32xf32>
    %265 = arith.addf %264, %242 : vector<8x32xf32>
    %c1_125 = arith.constant 1 : index
    %c0_126 = arith.constant 0 : index
    %c0_127 = arith.constant 0 : index
    %266 = vector.load %arg15[%c1_125, %c0_126, %c0_127] : memref<2x1x32xf32, #tpu.memory_space<vmem>>, vector<1x1x32xf32>
    %267 = vector.shape_cast %266 : vector<1x1x32xf32> to vector<1x32xf32>
    %c1_128 = arith.constant 1 : index
    %c0_129 = arith.constant 0 : index
    %c0_130 = arith.constant 0 : index
    %268 = vector.load %arg16[%c1_128, %c0_129, %c0_130] : memref<2x1x32xf32, #tpu.memory_space<vmem>>, vector<1x1x32xf32>
    %269 = vector.shape_cast %268 : vector<1x1x32xf32> to vector<1x32xf32>
    %cst_131 = arith.constant dense<0.000000e+00> : vector<8xf32>
    %270 = vector.multi_reduction <add>, %265, %cst_131 [1] : vector<8x32xf32> to vector<8xf32>
    %271 = vector.shape_cast %270 : vector<8xf32> to vector<8x1xf32>
    %cst_132 = arith.constant 3.200000e+01 : f32
    %272 = vector.broadcast %cst_132 : f32 to vector<8x1xf32>
    %273 = arith.divf %271, %272 : vector<8x1xf32>
    %274 = vector.broadcast %273 : vector<8x1xf32> to vector<8x32xf32>
    %275 = arith.subf %265, %274 : vector<8x32xf32>
    %276 = vector.broadcast %273 : vector<8x1xf32> to vector<8x32xf32>
    %277 = arith.subf %265, %276 : vector<8x32xf32>
    %278 = arith.mulf %275, %277 : vector<8x32xf32>
    %cst_133 = arith.constant dense<0.000000e+00> : vector<8xf32>
    %279 = vector.multi_reduction <add>, %278, %cst_133 [1] : vector<8x32xf32> to vector<8xf32>
    %280 = vector.shape_cast %279 : vector<8xf32> to vector<8x1xf32>
    %cst_134 = arith.constant 3.200000e+01 : f32
    %281 = vector.broadcast %cst_134 : f32 to vector<8x1xf32>
    %282 = arith.divf %280, %281 : vector<8x1xf32>
    %283 = vector.broadcast %273 : vector<8x1xf32> to vector<8x32xf32>
    %284 = arith.subf %265, %283 : vector<8x32xf32>
    %cst_135 = arith.constant 9.99999996E-13 : f32
    %285 = vector.broadcast %cst_135 : f32 to vector<8x1xf32>
    %286 = arith.addf %282, %285 : vector<8x1xf32>
    %287 = math.rsqrt %286 : vector<8x1xf32>
    %288 = vector.broadcast %287 : vector<8x1xf32> to vector<8x32xf32>
    %289 = arith.mulf %284, %288 : vector<8x32xf32>
    %290 = vector.broadcast %267 : vector<1x32xf32> to vector<8x32xf32>
    %291 = arith.mulf %289, %290 : vector<8x32xf32>
    %292 = vector.broadcast %269 : vector<1x32xf32> to vector<8x32xf32>
    %293 = arith.addf %291, %292 : vector<8x32xf32>
    %294 = vector.extract_strided_slice %293 {offsets = [0, 0], sizes = [1, 32], strides = [1, 1]} : vector<8x32xf32> to vector<1x32xf32>
    %c0_136 = arith.constant 0 : index
    %c0_137 = arith.constant 0 : index
    %295 = vector.load %arg17[%c0_136, %c0_137] : memref<32x32xf32, #tpu.memory_space<vmem>>, vector<32x32xf32>
    %cst_138 = arith.constant dense<0.000000e+00> : vector<1x32xf32>
    %296 = tpu.matmul %294, %295, %cst_138 {dimension_numbers = #tpu.dot_dimension_numbers<[1], [0], [0], [1], [0, 0, 1, 1], [], []>} : vector<1x32xf32>, vector<32x32xf32>, vector<1x32xf32> -> vector<1x32xf32>
    %c0_139 = arith.constant 0 : index
    %c0_140 = arith.constant 0 : index
    %297 = vector.load %arg18[%c0_139, %c0_140] : memref<1x32xf32, #tpu.memory_space<vmem>>, vector<1x32xf32>
    %298 = arith.addf %296, %297 : vector<1x32xf32>
    %299 = math.tanh %298 : vector<1x32xf32>
    %c0_141 = arith.constant 0 : index
    %c0_142 = arith.constant 0 : index
    %300 = vector.load %arg19[%c0_141, %c0_142] : memref<32x3xf32, #tpu.memory_space<vmem>>, vector<32x3xf32>
    %cst_143 = arith.constant dense<0.000000e+00> : vector<1x3xf32>
    %301 = tpu.matmul %299, %300, %cst_143 {dimension_numbers = #tpu.dot_dimension_numbers<[1], [0], [0], [1], [0, 0, 1, 1], [], []>} : vector<1x32xf32>, vector<32x3xf32>, vector<1x3xf32> -> vector<1x3xf32>
    %c0_144 = arith.constant 0 : index
    %c0_145 = arith.constant 0 : index
    %302 = vector.load %arg20[%c0_144, %c0_145] : memref<1x3xf32, #tpu.memory_space<vmem>>, vector<1x3xf32>
    %303 = arith.addf %301, %302 : vector<1x3xf32>
    %c0_146 = arith.constant 0 : index
    %c0_147 = arith.constant 0 : index
    %c0_148 = arith.constant 0 : index
    %304 = vector.load %arg21[%c0_146, %c0_147, %c0_148] : memref<1x1x3xf32, #tpu.memory_space<vmem>>, vector<1x1x3xf32>
    %305 = vector.shape_cast %304 : vector<1x1x3xf32> to vector<1x3xf32>
    %306 = vector.shape_cast %303 : vector<1x3xf32> to vector<1x1x3xf32>
    tpu.vector_store %arg21[%c0_146, %c0_147, %c0_148], %306 {strides = array<i32>} : memref<1x1x3xf32, #tpu.memory_space<vmem>>, vector<1x1x3xf32>,
    return
  }
  func.func @transform_0(%arg0: i32) -> (i32, i32, i32) {
    %c0_i32 = arith.constant 0 : i32
    %c0_i32_0 = arith.constant 0 : i32
    %c0_i32_1 = arith.constant 0 : i32
    return %arg0, %c0_i32, %c0_i32_0 : i32, i32, i32
  }
  func.func @transform_1(%arg0: i32) -> (i32, i32, i32) {
    %c0_i32 = arith.constant 0 : i32
    %c0_i32_0 = arith.constant 0 : i32
    %c0_i32_1 = arith.constant 0 : i32
    return %arg0, %c0_i32, %c0_i32_0 : i32, i32, i32
  }
  func.func @transform_2(%arg0: i32) -> (i32, i32) {
    %c0_i32 = arith.constant 0 : i32
    %c0_i32_0 = arith.constant 0 : i32
    %c0_i32_1 = arith.constant 0 : i32
    return %c0_i32, %c0_i32_0 : i32, i32
  }
  func.func @transform_3(%arg0: i32) -> (i32, i32) {
    %c0_i32 = arith.constant 0 : i32
    %c0_i32_0 = arith.constant 0 : i32
    %c0_i32_1 = arith.constant 0 : i32
    return %c0_i32, %c0_i32_0 : i32, i32
  }
  func.func @transform_4(%arg0: i32) -> (i32, i32, i32) {
    %c0_i32 = arith.constant 0 : i32
    %c0_i32_0 = arith.constant 0 : i32
    %c0_i32_1 = arith.constant 0 : i32
    %c0_i32_2 = arith.constant 0 : i32
    return %c0_i32, %c0_i32_0, %c0_i32_1 : i32, i32, i32
  }
  func.func @transform_5(%arg0: i32) -> (i32, i32, i32) {
    %c0_i32 = arith.constant 0 : i32
    %c0_i32_0 = arith.constant 0 : i32
    %c0_i32_1 = arith.constant 0 : i32
    %c0_i32_2 = arith.constant 0 : i32
    return %c0_i32, %c0_i32_0, %c0_i32_1 : i32, i32, i32
  }
  func.func @transform_6(%arg0: i32) -> (i32, i32, i32) {
    %c0_i32 = arith.constant 0 : i32
    %c0_i32_0 = arith.constant 0 : i32
    %c0_i32_1 = arith.constant 0 : i32
    %c0_i32_2 = arith.constant 0 : i32
    return %c0_i32, %c0_i32_0, %c0_i32_1 : i32, i32, i32
  }
  func.func @transform_7(%arg0: i32) -> (i32, i32, i32) {
    %c0_i32 = arith.constant 0 : i32
    %c0_i32_0 = arith.constant 0 : i32
    %c0_i32_1 = arith.constant 0 : i32
    %c0_i32_2 = arith.constant 0 : i32
    return %c0_i32, %c0_i32_0, %c0_i32_1 : i32, i32, i32
  }
  func.func @transform_8(%arg0: i32) -> (i32, i32, i32) {
    %c0_i32 = arith.constant 0 : i32
    %c0_i32_0 = arith.constant 0 : i32
    %c0_i32_1 = arith.constant 0 : i32
    %c0_i32_2 = arith.constant 0 : i32
    return %c0_i32, %c0_i32_0, %c0_i32_1 : i32, i32, i32
  }
  func.func @transform_9(%arg0: i32) -> (i32, i32, i32) {
    %c0_i32 = arith.constant 0 : i32
    %c0_i32_0 = arith.constant 0 : i32
    %c0_i32_1 = arith.constant 0 : i32
    %c0_i32_2 = arith.constant 0 : i32
    return %c0_i32, %c0_i32_0, %c0_i32_1 : i32, i32, i32
  }
  func.func @transform_10(%arg0: i32) -> (i32, i32, i32) {
    %c0_i32 = arith.constant 0 : i32
    %c0_i32_0 = arith.constant 0 : i32
    %c0_i32_1 = arith.constant 0 : i32
    %c0_i32_2 = arith.constant 0 : i32
    return %c0_i32, %c0_i32_0, %c0_i32_1 : i32, i32, i32
  }
  func.func @transform_11(%arg0: i32) -> (i32, i32, i32) {
    %c0_i32 = arith.constant 0 : i32
    %c0_i32_0 = arith.constant 0 : i32
    %c0_i32_1 = arith.constant 0 : i32
    %c0_i32_2 = arith.constant 0 : i32
    return %c0_i32, %c0_i32_0, %c0_i32_1 : i32, i32, i32
  }
  func.func @transform_12(%arg0: i32) -> (i32, i32, i32) {
    %c0_i32 = arith.constant 0 : i32
    %c0_i32_0 = arith.constant 0 : i32
    %c0_i32_1 = arith.constant 0 : i32
    %c0_i32_2 = arith.constant 0 : i32
    return %c0_i32, %c0_i32_0, %c0_i32_1 : i32, i32, i32
  }
  func.func @transform_13(%arg0: i32) -> (i32, i32, i32) {
    %c0_i32 = arith.constant 0 : i32
    %c0_i32_0 = arith.constant 0 : i32
    %c0_i32_1 = arith.constant 0 : i32
    %c0_i32_2 = arith.constant 0 : i32
    return %c0_i32, %c0_i32_0, %c0_i32_1 : i32, i32, i32
  }
  func.func @transform_14(%arg0: i32) -> (i32, i32, i32) {
    %c0_i32 = arith.constant 0 : i32
    %c0_i32_0 = arith.constant 0 : i32
    %c0_i32_1 = arith.constant 0 : i32
    %c0_i32_2 = arith.constant 0 : i32
    return %c0_i32, %c0_i32_0, %c0_i32_1 : i32, i32, i32
  }
  func.func @transform_15(%arg0: i32) -> (i32, i32, i32) {
    %c0_i32 = arith.constant 0 : i32
    %c0_i32_0 = arith.constant 0 : i32
    %c0_i32_1 = arith.constant 0 : i32
    %c0_i32_2 = arith.constant 0 : i32
    return %c0_i32, %c0_i32_0, %c0_i32_1 : i32, i32, i32
  }
  func.func @transform_16(%arg0: i32) -> (i32, i32) {
    %c0_i32 = arith.constant 0 : i32
    %c0_i32_0 = arith.constant 0 : i32
    %c0_i32_1 = arith.constant 0 : i32
    return %c0_i32, %c0_i32_0 : i32, i32
  }
  func.func @transform_17(%arg0: i32) -> (i32, i32) {
    %c0_i32 = arith.constant 0 : i32
    %c0_i32_0 = arith.constant 0 : i32
    %c0_i32_1 = arith.constant 0 : i32
    return %c0_i32, %c0_i32_0 : i32, i32
  }
  func.func @transform_18(%arg0: i32) -> (i32, i32) {
    %c0_i32 = arith.constant 0 : i32
    %c0_i32_0 = arith.constant 0 : i32
    %c0_i32_1 = arith.constant 0 : i32
    return %c0_i32, %c0_i32_0 : i32, i32
  }
  func.func @transform_19(%arg0: i32) -> (i32, i32) {
    %c0_i32 = arith.constant 0 : i32
    %c0_i32_0 = arith.constant 0 : i32
    %c0_i32_1 = arith.constant 0 : i32
    return %c0_i32, %c0_i32_0 : i32, i32
  }
  func.func @transform_20(%arg0: i32) -> (i32, i32, i32) {
    %c0_i32 = arith.constant 0 : i32
    %c0_i32_0 = arith.constant 0 : i32
    %c0_i32_1 = arith.constant 0 : i32
    return %arg0, %c0_i32, %c0_i32_0 : i32, i32, i32
  }
}

</mosaic_0001>

<bundles_post_ra>
// kernel: dann_forward.1
= control target key start
LH: loop header
LB: loop body
LE: loop exit
PB: predicated region body
PF: predicated region fallthrough
CT: control target
= control target key end

     0   :  { %s3417_s0 = inlined_call_operand.vmem [shape: f32[2,8,32], index: 0, kind: input, shape index: {}]   ;;  %s3418_s1 = inlined_call_operand.vmem [shape: f32[2,1,8], index: 1, kind: input, shape index: {}]   ;;  %s3419_s2 = inlined_call_operand.vmem [shape: f32[1,32], index: 2, kind: input, shape index: {}]   ;;  %s3420_s3 = inlined_call_operand.vmem [shape: f32[1,32], index: 3, kind: input, shape index: {}]   ;;  %s3421_s4 = inlined_call_operand.vmem [shape: f32[2,32,96], index: 4, kind: input, shape index: {}]   ;;  %s3422_s5 = inlined_call_operand.vmem [shape: f32[2,1,96], index: 5, kind: input, shape index: {}]   ;;  %s3423_s6 = inlined_call_operand.vmem [shape: f32[2,32,32], index: 6, kind: input, shape index: {}]   ;;  %s3424_s7 = inlined_call_operand.vmem [shape: f32[2,1,32], index: 7, kind: input, shape index: {}]   ;;  %s3425_s8 = inlined_call_operand.vmem [shape: f32[2,1,32], index: 8, kind: input, shape index: {}]   ;;  %s3426_s9 = inlined_call_operand.vmem [shape: f32[2,1,32], index: 9, kind: input, shape index: {}]   ;;  %s3427_s10 = inlined_call_operand.vmem [shape: f32[2,32,64], index: 10, kind: input, shape index: {}]   ;;  %s3428_s11 = inlined_call_operand.vmem [shape: f32[2,1,64], index: 11, kind: input, shape index: {}]   ;;  %s3429_s12 = inlined_call_operand.vmem [shape: f32[2,64,32], index: 12, kind: input, shape index: {}]   ;;  %s3430_s13 = inlined_call_operand.vmem [shape: f32[2,1,32], index: 13, kind: input, shape index: {}]   ;;  %s3431_s14 = inlined_call_operand.vmem [shape: f32[2,1,32], index: 14, kind: input, shape index: {}]   ;;  %s3432_s15 = inlined_call_operand.vmem [shape: f32[2,1,32], index: 15, kind: input, shape index: {}]   ;;  %s3433_s16 = inlined_call_operand.vmem [shape: f32[32,32], index: 16, kind: input, shape index: {}]   ;;  %s3434_s17 = inlined_call_operand.vmem [shape: f32[1,32], index: 17, kind: input, shape index: {}]   ;;  %s3435_s18 = inlined_call_operand.vmem [shape: f32[32,3], index: 18, kind: input, shape index: {}]   ;;  %s3436_s19 = inlined_call_operand.vmem [shape: f32[1,3], index: 19, kind: input, shape index: {}]   ;;  %s3437_s20 = inlined_call_operand.vmem [shape: f32[2,1,3], index: 20, kind: output, shape index: {}]  }
   0x1   :  { %3440 = sst [smem:[#allocation2_spill]] %s3417_s0 }
   0x2   :  { %3441 = sst [smem:[#allocation3_spill]] %s3418_s1  ;;  %s3018_s1 = smov 0  }
   0x3   :  { %3442 = sst [smem:[#allocation4_spill]] %s3419_s2 }
   0x4   :  { %3443 = sst [smem:[#allocation5_spill]] %s3420_s3 }
   0x5   :  { %3444 = sst [smem:[#allocation6_spill]] %s3421_s4 }
   0x6 LB: > { %s2524_s22 = sadd.s32 4294967295, %s2904_s1   ;;  %p2528_p0 = scmp.ge.s32.totalorder %s2904_s1, 1  ;;  %s2904_s1 = sphi %s3018_s1, %s30_s1  }
   0x7   : > { %p569_p1 = scmp.lt.s32.totalorder %s2904_s1, 3 }
   0x9   : > { %p570_p2 = pnand %p2528_p0, %p569_p1 }
   0xa   : > { %p627_p3 = scmp.lt.s32.totalorder (!%p570_p2), %s2524_s22, 1  ;;  %s3445_s25 = sld [smem:[#allocation2_spill]] (!%p570_p2) }
   0xb   : > { %573 = sbr.rel (%p570_p2) target bundleno = 6424 (0x1918), region = 100  ;;  %s3446_s28 = sld [smem:[#allocation6_spill]] (!%p570_p2) }
   0xc   : > { %s3448_s27 = sld [smem:[#allocation5_spill]] (!%p570_p2)  ;;  %s2908_s30 = smov (!%p570_p2), 96  }
   0xd   : > { %s2909_s2 = smov (!%p570_p2), 64   ;;  %s3439_s0 = smov (!%p570_p2), 48  }
  0x10   : > { %s3452_s22 = smov (!%p627_p3, %s2524_s22), 1  ;;  %vm641_vm0 = vcmask 261120   ;;  %v2906_v8 = vmov 0.0   ;;  %vm2907_vm1 = vmmov 0   ;;  %v2532_v21 = vld [vmem:[%s3422_s5] ss:$0 sm:$0xff] }
  0x11   : > { %s2529_s23 = sshll.u32 %s3452_s22, 3  ;;  %v673_v7 = vld [vmem:[%s3446_s28 + $0x18] sm:$0xff]  ;;  %2679 = vmatprep.subr.mxu0 %v2906_v8  ;;  %v672_v9 = vld [vmem:[%s3446_s28 + $0x10] sm:$0xff]  ;;  %2687 = vmatprep.mubr.msk.f32.mxu0 %vm2907_vm1, %v2906_v8  ;;  %v671_v10 = vld [vmem:[%s3446_s28 + $0x8] sm:$0xff]  ;;  %vm768_vm2 = vcmask 130048   ;;  %vm843_vm3 = vcmask 64512  }
  0x12   : > { %s630_s3 = scalar_lea.vmem %s3445_s25, %s2529_s23  ;;  %2680 = vmatpush3.msra.mxu0 %v673_v7  ;;  %2690 = vmatprep.subr.mxu1 %v2906_v8  ;;  %v670_v11 = vld [vmem:[%s3446_s28] sm:$0xff]  ;;  %s3447_s25 = sld [smem:[#allocation4_spill]]  ;;  %v755_v40 = vld [vmem:[%s3423_s6 + $0x8] sm:$0xff]  ;;  %v757_v58 = vld [vmem:[%s3423_s6 + $0x18] sm:$0xff]  ;;  %vm1384_vm4 = vcmask 523264   ;;  %vm2466_vm5 = vcmask 16384  }
  0x13   : > { %v637_v0 = vld [vmem:[%s630_s3] sm:$0xff]  ;;  %2681 = vmatprep.subr.mxu0 %v2906_v8  ;;  %2692 = vmatprep.mubr.msk.f32.mxu1 %vm2907_vm1, %v2906_v8  ;;  %s3449_s23 = sld [smem:[#allocation3_spill]]  ;;  %s2911_s3 = smov 112   ;;  %v756_v62 = vld [vmem:[%s3423_s6 + $0x10] sm:$0xff] }
  0x14   : > { %v642_v1 = vsel %vm641_vm0, %v637_v0, 0.0  ;;  %2682 = vmatpush3.msra.mxu0 %v672_v9  ;;  %v2531_v18 = vld [vmem:[%s3448_s27] ss:$0 sm:$0xff]  ;;  %s3450_s27 = smov 48  }
  0x15   : > { %643 = vadd.xlane.f32.xlu0 %v642_v1  ;;  %2683 = vmatprep.subr.mxu0 %v2906_v8  ;;  %v754_v41 = vld [vmem:[%s3423_s6] sm:$0xff] }
  0x16   : > { %2684 = vmatpush3.msra.mxu0 %v671_v10  ;;  %v2539_v1 = vld [vmem:[%s3424_s7] ss:$0 sm:$0xff] }
  0x17   : > { %2685 = vmatprep.subr.mxu0 %v2906_v8 }
  0x18   : > { %2686 = vmatpush3.msra.mxu0 %v670_v11  ;;  %v2530_v16 = vld [vmem:[%s3447_s25] ss:$0 sm:$0xff]  ;;  %s2910_s25 = smov 80  }
  0x19   : > { %2712 = vmatprep.subr.mxu0 %v2906_v8  ;;  %s633_s24 = scalar_lea.vmem %s3449_s23, %s3452_s22 }
  0x1a   : > { %v3085_v26 = vld [vmem:[%s633_s24] ss:$0 sm:$0xff]  ;;  %s636_s24 = scalar_lea.vmem %s3437_s20, %s3452_s22 }
  0x9e   : > { %v644_v2 = vpop.xlane.xlu0 %643 }
  0x9f   : > { %v646_v3 = vmul.f32 0.03125, %v644_v2 }
  0xa1   : > { %v647_v4 = vsub.f32 %v637_v0, %v646_v3 }
  0xa3   : > { %v648_v5 = vmul.f32 %v647_v4, %v647_v4 }
  0xa5   : > { %v649_v6 = vsel %vm641_vm0, %v648_v5, 0.0 }
  0xa6   : > { %650 = vadd.xlane.f32.xlu0 %v649_v6 }
 0x12f   : > { %v651_v12 = vpop.xlane.xlu0 %650 }
 0x130   : > { %v652_v13 = vmul.f32 0.03125, %v651_v12 }
 0x132   : > { %v653_v14 = vadd.f32 1e-12, %v652_v13 }
 0x134   : > { %2866 = vrsqrt.f32 %v653_v14  ;;  %v1283_v14 = vld [vmem:[%s3427_s10 + $0x18] sm:$0xff] }
 0x141   : > { %v2867_v15 = vpop.eup %2866 }
 0x142   : > { %v655_v17 = vmul.f32 %v2867_v15, %v647_v4  ;;  %v1282_v15 = vld [vmem:[%s3427_s10 + $0x10] sm:$0xff] }
 0x144   : > { %v662_v19 = vmul.f32 %v2530_v16, %v655_v17  ;;  %v1281_v16 = vld [vmem:[%s3427_s10 + $0x8] sm:$0xff]  ;;  %v1280_v17 = vld [vmem:[%s3427_s10] sm:$0xff] }
 0x146   : > { %v3062_v20 = vadd.f32 %v2531_v18, %v662_v19 }
 0x148   : > { %2688 = vmatmul.mubr.msk.f32.vlgmr.msra.gmra.mxu0 %vm641_vm0, %v3062_v20 }
 0x149   : > { %2714 = vmatprep.mubr.msk.f32.mxu0 %vm2907_vm1, %v2906_v8 }
 0x208   : > { %v750_v22 = vpop.f32.mrf.mxu0 }
 0x209   : > { %v3071_v23 = vadd.f32 %v2532_v21, %v750_v22  ;;  %v2544_v22 = vld [vmem:[%s3425_s8] ss:$0 sm:$0xff] }
 0x20a   : > { %v2689_v24 = vpop.f32.mrf.mxu0 }
 0x20b   : > { %766 = vrot.lane.b32.xlu1 %v3071_v23, %s2908_s30  ;;  %v2545_v24 = vld [vmem:[%s3426_s9] ss:$0 sm:$0xff] }
 0x27d   : > { %v767_v25 = vpop.permute.xlu1 %766 }
 0x27e   : > { %2691 = vmatpush3.xpose.msk.msra.mxu1 %vm768_vm2, %v767_v25 }
 0x27f   : > { %2695 = vmatprep.subr.mxu1 %v2906_v8 }
 0x281   : > { %2693 = vmatmul.mubr.msk.f32.vlgmr.msra.gmra.mxu1 %vm768_vm2, %v3071_v23 }
 0x282   : > { %2697 = vmatprep.mubr.msk.f32.mxu1 %vm2907_vm1, %v2906_v8 }
 0x341   : > { %v839_v27 = vpop.f32.mrf.mxu1 }
 0x342   : > { %v840_v28 = vadd.f32 %v3085_v26, %v839_v27 }
 0x343   : > { %v2694_v29 = vpop.f32.mrf.mxu1 }
 0x344   : > { %v844_v30 = vsel %vm843_vm3, %v840_v28, -inf  ;;  %v1375_v29 = vld [vmem:[%s3429_s12 + $0x30] sm:$0xff] }
 0x345   : > { %845 = vmax.xlane.f32.xlu1 %v844_v30  ;;  %v1374_v30 = vld [vmem:[%s3429_s12 + $0x28] sm:$0xff] }
 0x3ce   : > { %v846_v31 = vpop.xlane.xlu1 %845 }
 0x3cf   : > { %v847_v32 = vsub.f32 %v840_v28, %v846_v31  ;;  %v1376_v28 = vld [vmem:[%s3429_s12 + $0x38] sm:$0xff]  ;;  %v1373_v31 = vld [vmem:[%s3429_s12 + $0x20] sm:$0xff] }
 0x3d1   : > { %v848_v33 = vmul.f32 1.442695, %v847_v32  ;;  %v1372_v32 = vld [vmem:[%s3429_s12 + $0x18] sm:$0xff] }
 0x3d3   : > { %2868 = vpow2.f32 %v848_v33  ;;  %v1371_v33 = vld [vmem:[%s3429_s12 + $0x10] sm:$0xff] }
 0x3e0   : > { %v2869_v34 = vpop.eup %2868 }
 0x3e1   : > { %v850_v35 = vsel %vm843_vm3, %v2869_v34, 0.0 }
 0x3e2   : > { %851 = vadd.xlane.f32.xlu0 %v850_v35  ;;  %v1369_v35 = vld [vmem:[%s3429_s12] sm:$0xff] }
 0x3f8   : > { %855 = vrot.lane.b32.xlu0 %v3071_v23, %s2909_s2 }
 0x3fc   : > { %1013 = vrot.lane.b32.xlu0 %v3071_v23, %s2910_s25 }
 0x400   : > { %1011 = vrot.lane.b32.xlu0 %v3071_v23, %s2911_s3 }
 0x46b   : > { %v852_v36 = vpop.xlane.xlu0 %851 }
 0x46c   : > { %2870 = vrcp.f32 %v852_v36  ;;  %v2546_v36 = vld [vmem:[%s3428_s11] ss:$0 sm:$0xff] }
 0x46f   : > { %v856_v37 = vpop.permute.xlu0 %855 }
 0x470   : > { %2696 = vmatpush3.msra.mxu1 %v856_v37 }
 0x471   : > { %2700 = vmatprep.subr.mxu1 %v2906_v8 }
 0x473   : > { %v1014_v42 = vpop.permute.xlu0 %1013 }
 0x477   : > { %v1012_v45 = vpop.permute.xlu0 %1011 }
 0x479   : > { %v2871_v38 = vpop.eup %2870 }
 0x47a   : > { %v854_v39 = vmul.f32 %v2871_v38, %v2869_v34  ;;  %v1370_v34 = vld [vmem:[%s3429_s12 + $0x8] sm:$0xff] }
 0x47c   : > { %2698 = vmatmul.mubr.msk.f32.vlgmr.msra.gmra.mxu1 %vm843_vm3, %v854_v39 }
 0x47d   : > { %2701 = vmatpush3.msra.mxu1 %v755_v40  ;;  %2704 = vmatprep.mubr.msk.f32.mxu1 %vm2907_vm1, %v2906_v8 }
 0x47e   : > { %2702 = vmatprep.subr.mxu1 %v2906_v8 }
 0x47f   : > { %2703 = vmatpush3.msra.mxu1 %v754_v41 }
 0x480   : > { %2707 = vmatprep.subr.mxu1 %v2906_v8 }
 0x53c   : > { %v927_v43 = vpop.f32.mrf.mxu1 }
 0x53d   : > { %2705 = vmatmul.mubr.msk.f32.vlgmr.msra.gmra.mxu1 %vm768_vm2, %v927_v43 }
 0x53e   : > { %2708 = vmatpush3.xpose.msk.msra.mxu1 %vm768_vm2, %v1014_v42  ;;  %v2699_v44 = vpop.f32.mrf.mxu1  ;;  %2709 = vmatprep.mubr.msk.f32.mxu1 %vm2907_vm1, %v2906_v8 }
 0x53f   : > { %2717 = vmatprep.subr.mxu1 %v2906_v8 }
 0x541   : > { %2710 = vmatmul.mubr.msk.f32.vlgmr.msra.gmra.mxu1 %vm768_vm2, %v1012_v45  ;;  %v2548_v45 = vld [vmem:[%s3430_s13] ss:$0 sm:$0xff] }
 0x542   : > { %2721 = vmatprep.mubr.msk.f32.mxu1 %vm2907_vm1, %v2906_v8  ;;  %2718 = vmatpush3.msra.mxu1 %v757_v58  ;;  %v2553_v58 = vld [vmem:[%s3446_s28 + $0x28] sm:$0xff] }
 0x543   : > { %2719 = vmatprep.subr.mxu1 %v2906_v8 }
 0x544   : > { %2720 = vmatpush3.msra.mxu1 %v756_v62 }
 0x545   : > { %2735 = vmatprep.subr.mxu1 %v2906_v8 }
 0x5fd   : > { %v1000_v46 = vpop.f32.mrf.mxu1 }
 0x5fe   : > { %v1010_v2 = vadd.f32 %v2539_v1, %v1000_v46 }
 0x5ff   : > { %v2706_v47 = vpop.f32.mrf.mxu1 }
 0x601   : > { %v1085_v48 = vpop.f32.mrf.mxu1 }
 0x602   : > { %v1086_v49 = vadd.f32 %v3085_v26, %v1085_v48 }
 0x603   : > { %v2711_v50 = vpop.f32.mrf.mxu1 }
 0x604   : > { %v1089_v51 = vsel %vm843_vm3, %v1086_v49, -inf }
 0x605   : > { %1090 = vmax.xlane.f32.xlu1 %v1089_v51 }
 0x616   : > { %1100 = vrot.lane.b32.xlu1 %v3071_v23, %s3439_s0 }
 0x68e   : > { %v1091_v52 = vpop.xlane.xlu1 %1090 }
 0x68f   : > { %v1092_v53 = vsub.f32 %v1086_v49, %v1091_v52 }
 0x691   : > { %v1093_v54 = vmul.f32 1.442695, %v1092_v53 }
 0x692   : > { %v1101_v55 = vpop.permute.xlu1 %1100 }
 0x693   : > { %2872 = vpow2.f32 %v1093_v54  ;;  %2713 = vmatpush3.msra.mxu0 %v1101_v55 }
 0x694   : > { %2724 = vmatprep.subr.mxu0 %v2906_v8 }
 0x6a0   : > { %v2873_v56 = vpop.eup %2872 }
 0x6a1   : > { %v1095_v57 = vsel %vm843_vm3, %v2873_v56, 0.0 }
 0x6a2   : > { %1096 = vadd.xlane.f32.xlu0 %v1095_v57  ;;  %v2554_v57 = vld [vmem:[%s3446_s28 + $0x30] sm:$0xff] }
 0x72b   : > { %v1097_v59 = vpop.xlane.xlu0 %1096 }
 0x72c   : > { %2874 = vrcp.f32 %v1097_v59  ;;  %v2552_v59 = vld [vmem:[%s3446_s28 + $0x20] sm:$0xff] }
 0x739   : > { %v2875_v60 = vpop.eup %2874 }
 0x73a   : > { %v1099_v61 = vmul.f32 %v2875_v60, %v2873_v56  ;;  %v2555_v56 = vld [vmem:[%s3446_s28 + $0x38] sm:$0xff] }
 0x73c   : > { %2715 = vmatmul.mubr.msk.f32.vlgmr.msra.gmra.mxu0 %vm843_vm3, %v1099_v61 }
 0x73d   : > { %2732 = vmatprep.mubr.msk.f32.mxu0 %vm2907_vm1, %v2906_v8  ;;  %2725 = vmatpush3.msra.mxu0 %v1283_v14 }
 0x73e   : > { %2726 = vmatprep.subr.mxu0 %v2906_v8 }
 0x73f   : > { %2727 = vmatpush3.msra.mxu0 %v1282_v15 }
 0x740   : > { %2728 = vmatprep.subr.mxu0 %v2906_v8 }
 0x741   : > { %2729 = vmatpush3.msra.mxu0 %v1281_v16 }
 0x742   : > { %2730 = vmatprep.subr.mxu0 %v2906_v8 }
 0x743   : > { %2731 = vmatpush3.msra.mxu0 %v1280_v17 }
 0x744   : > { %2754 = vmatprep.subr.mxu0 %v2906_v8 }
 0x7fc   : > { %v1172_v63 = vpop.f32.mrf.mxu0 }
 0x7fd   : > { %2722 = vmatmul.mubr.msk.f32.vlgmr.msra.gmra.mxu1 %vm768_vm2, %v1172_v63 }
 0x7fe   : > { %v2716_v0 = vpop.f32.mrf.mxu0  ;;  %2751 = vmatprep.mubr.msk.f32.mxu1 %vm2907_vm1, %v2906_v8  ;;  %2736 = vmatpush3.msra.mxu1 %v1376_v28  ;;  %v2559_v28 = vld [vmem:[%s3423_s6 + $0x20] sm:$0xff] }
 0x7ff   : > { %2737 = vmatprep.subr.mxu1 %v2906_v8  ;;  %v2550_v0 = vld [vmem:[%s3431_s14] ss:$0 sm:$0xff] }
 0x800   : > { %2738 = vmatpush3.msra.mxu1 %v1375_v29 }
 0x801   : > { %2739 = vmatprep.subr.mxu1 %v2906_v8 }
 0x802   : > { %2740 = vmatpush3.msra.mxu1 %v1374_v30 }
 0x803   : > { %2741 = vmatprep.subr.mxu1 %v2906_v8 }
 0x804   : > { %2742 = vmatpush3.msra.mxu1 %v1373_v31 }
 0x805   : > { %2743 = vmatprep.subr.mxu1 %v2906_v8 }
 0x806   : > { %2744 = vmatpush3.msra.mxu1 %v1372_v32 }
 0x807   : > { %2745 = vmatprep.subr.mxu1 %v2906_v8 }
 0x808   : > { %2746 = vmatpush3.msra.mxu1 %v1371_v33 }
 0x809   : > { %2747 = vmatprep.subr.mxu1 %v2906_v8 }
 0x80a   : > { %2748 = vmatpush3.msra.mxu1 %v1370_v34 }
 0x80b   : > { %2749 = vmatprep.subr.mxu1 %v2906_v8 }
 0x80c   : > { %2750 = vmatpush3.msra.mxu1 %v1369_v35 }
 0x80d   : > { %2770 = vmatprep.subr.mxu1 %v2906_v8 }
 0x8bd   : > { %v1245_v3 = vpop.f32.mrf.mxu1 }
 0x8be   : > { %v1249_v4 = vadd.f32 %v1245_v3, %v1010_v2  ;;  %v2551_v2 = vld [vmem:[%s3432_s15] ss:$0 sm:$0xff] }
 0x8bf   : > { %v2723_v5 = vpop.f32.mrf.mxu1 }
 0x8c0   : > { %v1250_v6 = vadd.f32 %v1249_v4, %v3062_v20  ;;  %v2557_v5 = vld [vmem:[%s3422_s5 + $0x1] ss:$0 sm:$0xff] }
 0x8c2   : > { %v1253_v7 = vsel %vm641_vm0, %v1250_v6, 0.0 }
 0x8c3   : > { %1254 = vadd.xlane.f32.xlu1 %v1253_v7 }
 0x94c   : > { %v1255_v9 = vpop.xlane.xlu1 %1254 }
 0x94d   : > { %v1256_v10 = vmul.f32 0.03125, %v1255_v9 }
 0x94f   : > { %v1257_v11 = vsub.f32 %v1250_v6, %v1256_v10 }
 0x951   : > { %v1258_v12 = vmul.f32 %v1257_v11, %v1257_v11 }
 0x953   : > { %v1259_v13 = vsel %vm641_vm0, %v1258_v12, 0.0 }
 0x954   : > { %1260 = vadd.xlane.f32.xlu0 %v1259_v13 }
 0x9dd   : > { %v1261_v18 = vpop.xlane.xlu0 %1260 }
 0x9de   : > { %v1262_v19 = vmul.f32 0.03125, %v1261_v18 }
 0x9e0   : > { %v1263_v20 = vadd.f32 1e-12, %v1262_v19 }
 0x9e2   : > { %2876 = vrsqrt.f32 %v1263_v20  ;;  %v2560_v20 = vld [vmem:[%s3423_s6 + $0x28] sm:$0xff] }
 0x9ef   : > { %v2877_v21 = vpop.eup %2876 }
 0x9f0   : > { %v1265_v23 = vmul.f32 %v2877_v21, %v1257_v11 }
 0x9f2   : > { %v1272_v25 = vmul.f32 %v2544_v22, %v1265_v23 }
 0x9f4   : > { %v1279_v27 = vadd.f32 %v2545_v24, %v1272_v25 }
 0x9f6   : > { %2733 = vmatmul.mubr.msk.f32.vlgmr.msra.gmra.mxu0 %vm641_vm0, %v1279_v27 }
 0x9f7   : > { %2762 = vmatprep.mubr.msk.f32.mxu0 %vm2907_vm1, %v2906_v8  ;;  %2755 = vmatpush3.msra.mxu0 %v2555_v56 }
 0x9f8   : > { %2756 = vmatprep.subr.mxu0 %v2906_v8 }
 0x9f9   : > { %2757 = vmatpush3.msra.mxu0 %v2554_v57 }
 0x9fa   : > { %2758 = vmatprep.subr.mxu0 %v2906_v8 }
 0x9fb   : > { %2759 = vmatpush3.msra.mxu0 %v2553_v58 }
 0x9fc   : > { %2760 = vmatprep.subr.mxu0 %v2906_v8 }
 0x9fd   : > { %2761 = vmatpush3.msra.mxu0 %v2552_v59 }
 0x9fe   : > { %2765 = vmatprep.subr.mxu0 %v2906_v8 }
 0xab6   : > { %v1360_v37 = vpop.f32.mrf.mxu0 }
 0xab7   : > { %v1361_v38 = vadd.f32 %v2546_v36, %v1360_v37 }
 0xab8   : > { %v2734_v39 = vpop.f32.mrf.mxu0 }
 0xab9   : > { %v1365_v40 = vmul.f32 0.70710677, %v1361_v38  ;;  %v1364_v42 = vmul.f32 0.5, %v1361_v38 }
 0xabb   : > { %2878 = verf.f32 %v1365_v40 }
 0xac8   : > { %v2879_v41 = vpop.eup %2878 }
 0xac9   : > { %v1367_v43 = vadd.f32 1.0, %v2879_v41 }
 0xacb   : > { %v1368_v44 = vmul.f32 %v1367_v43, %v1364_v42 }
 0xacd   : > { %2752 = vmatmul.mubr.msk.f32.vlgmr.msra.gmra.mxu1 %vm1384_vm4, %v1368_v44 }
 0xace   : > { %2772 = vmatprep.mubr.msk.f32.mxu1 %vm2907_vm1, %v2906_v8 }
 0xb8d   : > { %v1454_v46 = vpop.f32.mrf.mxu1 }
 0xb8e   : > { %v1455_v47 = vadd.f32 %v2548_v45, %v1454_v46  ;;  %v2561_v46 = vld [vmem:[%s3423_s6 + $0x30] sm:$0xff] }
 0xb8f   : > { %v2753_v48 = vpop.f32.mrf.mxu1 }
 0xb90   : > { %v1458_v49 = vadd.f32 %v1455_v47, %v1279_v27 }
 0xb92   : > { %v1461_v50 = vsel %vm641_vm0, %v1458_v49, 0.0 }
 0xb93   : > { %1462 = vadd.xlane.f32.xlu0 %v1461_v50 }
 0xc1c   : > { %v1463_v51 = vpop.xlane.xlu0 %1462 }
 0xc1d   : > { %v1464_v52 = vmul.f32 0.03125, %v1463_v51 }
 0xc1f   : > { %v1465_v53 = vsub.f32 %v1458_v49, %v1464_v52  ;;  %v2568_v49 = vld [vmem:[%s3424_s7 + $0x1] ss:$0 sm:$0xff] }
 0xc21   : > { %v1466_v54 = vmul.f32 %v1465_v53, %v1465_v53 }
 0xc23   : > { %v1467_v55 = vsel %vm641_vm0, %v1466_v54, 0.0 }
 0xc24   : > { %1468 = vadd.xlane.f32.xlu0 %v1467_v55 }
 0xcad   : > { %v1469_v60 = vpop.xlane.xlu0 %1468 }
 0xcae   : > { %v1470_v61 = vmul.f32 0.03125, %v1469_v60 }
 0xcb0   : > { %v1471_v62 = vadd.f32 1e-12, %v1470_v61  ;;  %v2580_v61 = vld [vmem:[%s3427_s10 + $0x38] sm:$0xff] }
 0xcb2   : > { %2880 = vrsqrt.f32 %v1471_v62  ;;  %v2579_v62 = vld [vmem:[%s3427_s10 + $0x30] sm:$0xff] }
 0xcbf   : > { %v2881_v63 = vpop.eup %2880 }
 0xcc0   : > { %v1473_v1 = vmul.f32 %v2881_v63, %v1465_v53  ;;  %v2578_v63 = vld [vmem:[%s3427_s10 + $0x28] sm:$0xff] }
 0xcc2   : > { %v1480_v3 = vmul.f32 %v2550_v0, %v1473_v1  ;;  %v2577_v0 = vld [vmem:[%s3427_s10 + $0x20] sm:$0xff] }
 0xcc4   : > { %v3232_v4 = vadd.f32 %v2551_v2, %v1480_v3 }
 0xcc6   : > { %2763 = vmatmul.mubr.msk.f32.vlgmr.msra.gmra.mxu0 %vm641_vm0, %v3232_v4 }
 0xcc7   : > { %2767 = vmatprep.mubr.msk.f32.mxu0 %vm2907_vm1, %v2906_v8 }
 0xd86   : > { %v1570_v6 = vpop.f32.mrf.mxu0 }
 0xd87   : > { %v1571_v7 = vadd.f32 %v2557_v5, %v1570_v6  ;;  %v2575_v5 = vld [vmem:[%s3425_s8 + $0x1] ss:$0 sm:$0xff] }
 0xd88   : > { %v2764_v9 = vpop.f32.mrf.mxu0 }
 0xd89   : > { %1582 = vrot.lane.b32.xlu0 %v1571_v7, %s2908_s30 }
 0xd8d   : > { %1827 = vrot.lane.b32.xlu0 %v1571_v7, %s2910_s25 }
 0xd91   : > { %1825 = vrot.lane.b32.xlu0 %v1571_v7, %s2911_s3 }
 0xdfb   : > { %v1583_v10 = vpop.permute.xlu0 %1582 }
 0xdfc   : > { %2766 = vmatpush3.xpose.msk.msra.mxu0 %vm768_vm2, %v1583_v10 }
 0xdfd   : > { %2775 = vmatprep.subr.mxu0 %v2906_v8 }
 0xdff   : > { %2768 = vmatmul.mubr.msk.f32.vlgmr.msra.gmra.mxu0 %vm768_vm2, %v1571_v7  ;;  %v1828_v24 = vpop.permute.xlu0 %1827 }
 0xe00   : > { %2779 = vmatprep.mubr.msk.f32.mxu0 %vm2907_vm1, %v2906_v8  ;;  %2776 = vmatpush3.msra.mxu0 %v2560_v20 }
 0xe01   : > { %2777 = vmatprep.subr.mxu0 %v2906_v8 }
 0xe02   : > { %2778 = vmatpush3.msra.mxu0 %v2559_v28 }
 0xe03   : > { %v1826_v27 = vpop.permute.xlu0 %1825  ;;  %2787 = vmatprep.subr.mxu0 %v2906_v8 }
 0xebf   : > { %v1654_v11 = vpop.f32.mrf.mxu0 }
 0xec0   : > { %v1655_v12 = vadd.f32 %v3085_v26, %v1654_v11  ;;  %v2591_v11 = vld [vmem:[%s3429_s12 + $0x78] sm:$0xff] }
 0xec1   : > { %v2769_v13 = vpop.f32.mrf.mxu0 }
 0xec2   : > { %v1658_v14 = vsel %vm843_vm3, %v1655_v12, -inf  ;;  %v2589_v13 = vld [vmem:[%s3429_s12 + $0x68] sm:$0xff] }
 0xec3   : > { %1659 = vmax.xlane.f32.xlu1 %v1658_v14  ;;  %v2588_v14 = vld [vmem:[%s3429_s12 + $0x60] sm:$0xff] }
 0xf4c   : > { %v1660_v15 = vpop.xlane.xlu1 %1659 }
 0xf4d   : > { %v1661_v16 = vsub.f32 %v1655_v12, %v1660_v15  ;;  %v2590_v12 = vld [vmem:[%s3429_s12 + $0x70] sm:$0xff]  ;;  %v2587_v15 = vld [vmem:[%s3429_s12 + $0x58] sm:$0xff] }
 0xf4f   : > { %v1662_v17 = vmul.f32 1.442695, %v1661_v16  ;;  %v2586_v16 = vld [vmem:[%s3429_s12 + $0x50] sm:$0xff] }
 0xf51   : > { %2882 = vpow2.f32 %v1662_v17  ;;  %v2585_v17 = vld [vmem:[%s3429_s12 + $0x48] sm:$0xff] }
 0xf5e   : > { %v2883_v18 = vpop.eup %2882 }
 0xf5f   : > { %v1664_v19 = vsel %vm843_vm3, %v2883_v18, 0.0 }
 0xf60   : > { %1665 = vadd.xlane.f32.xlu1 %v1664_v19  ;;  %v2582_v19 = vld [vmem:[%s3428_s11 + $0x1] ss:$0 sm:$0xff] }
 0xf71   : > { %1669 = vrot.lane.b32.xlu1 %v1571_v7, %s2909_s2 }
 0xfe9   : > { %v1666_v21 = vpop.xlane.xlu1 %1665 }
 0xfea   : > { %2884 = vrcp.f32 %v1666_v21 }
 0xfed   : > { %v1670_v22 = vpop.permute.xlu1 %1669 }
 0xfee   : > { %2771 = vmatpush3.msra.mxu1 %v1670_v22 }
 0xfef   : > { %2782 = vmatprep.subr.mxu1 %v2906_v8 }
 0xff7   : > { %v2885_v23 = vpop.eup %2884 }
 0xff8   : > { %v1668_v25 = vmul.f32 %v2885_v23, %v2883_v18  ;;  %v2584_v18 = vld [vmem:[%s3429_s12 + $0x40] sm:$0xff] }
 0xffa   : > { %2773 = vmatmul.mubr.msk.f32.vlgmr.msra.gmra.mxu1 %vm843_vm3, %v1668_v25 }
 0xffb   : > { %2783 = vmatpush3.xpose.msk.msra.mxu1 %vm768_vm2, %v1828_v24  ;;  %2784 = vmatprep.mubr.msk.f32.mxu1 %vm2907_vm1, %v2906_v8 }
 0xffc   : > { %2792 = vmatprep.subr.mxu1 %v2906_v8 }
 0xffe   : > { %2785 = vmatmul.mubr.msk.f32.vlgmr.msra.gmra.mxu1 %vm768_vm2, %v1826_v27 }
 0xfff   : > { %2796 = vmatprep.mubr.msk.f32.mxu1 %vm2907_vm1, %v2906_v8 }
0x10ba   : > { %v1741_v29 = vpop.f32.mrf.mxu1 }
0x10bb   : > { %2780 = vmatmul.mubr.msk.f32.vlgmr.msra.gmra.mxu0 %vm768_vm2, %v1741_v29  ;;  %v2593_v29 = vld [vmem:[%s3430_s13 + $0x1] ss:$0 sm:$0xff] }
0x10bc   : > { %v2774_v30 = vpop.f32.mrf.mxu1  ;;  %2789 = vmatprep.mubr.msk.f32.mxu0 %vm2907_vm1, %v2906_v8 }
0x10be   : > { %v1899_v31 = vpop.f32.mrf.mxu1 }
0x10bf   : > { %v1900_v32 = vadd.f32 %v3085_v26, %v1899_v31  ;;  %v2562_v26 = vld [vmem:[%s3423_s6 + $0x38] sm:$0xff] }
0x10c0   : > { %v2786_v33 = vpop.f32.mrf.mxu1  ;;  %2793 = vmatpush3.msra.mxu1 %v2562_v26  ;;  %v2311_v26 = vld [vmem:[%s3433_s16 + $0x10] sm:$0xff] }
0x10c1   : > { %v1903_v34 = vsel %vm843_vm3, %v1900_v32, -inf  ;;  %2794 = vmatprep.subr.mxu1 %v2906_v8 }
0x10c2   : > { %1904 = vmax.xlane.f32.xlu0 %v1903_v34  ;;  %2795 = vmatpush3.msra.mxu1 %v2561_v46 }
0x10c3   : > { %2810 = vmatprep.subr.mxu1 %v2906_v8 }
0x10d8   : > { %1914 = vrot.lane.b32.xlu0 %v1571_v7, %s3450_s27  ;;  %v2576_v7 = vld [vmem:[%s3426_s9 + $0x1] ss:$0 sm:$0xff] }
0x114b   : > { %v1905_v35 = vpop.xlane.xlu0 %1904 }
0x114c   : > { %v1906_v36 = vsub.f32 %v1900_v32, %v1905_v35 }
0x114e   : > { %v1907_v37 = vmul.f32 1.442695, %v1906_v36 }
0x114f   : > { %v1915_v38 = vpop.permute.xlu0 %1914 }
0x1150   : > { %2886 = vpow2.f32 %v1907_v37  ;;  %2788 = vmatpush3.msra.mxu0 %v1915_v38 }
0x1151   : > { %2799 = vmatprep.subr.mxu0 %v2906_v8 }
0x115d   : > { %v2887_v39 = vpop.eup %2886 }
0x115e   : > { %v1909_v40 = vsel %vm843_vm3, %v2887_v39, 0.0 }
0x115f   : > { %1910 = vadd.xlane.f32.xlu1 %v1909_v40  ;;  %v2312_v40 = vld [vmem:[%s3433_s16 + $0x18] sm:$0xff] }
0x117b   : > { %v1814_v41 = vpop.f32.mrf.mxu0 }
0x117c   : > { %v1824_v50 = vadd.f32 %v2568_v49, %v1814_v41  ;;  %v2310_v41 = vld [vmem:[%s3433_s16 + $0x8] sm:$0xff]  ;;  %v2598_v49 = vld [vmem:[%s3432_s15 + $0x1] ss:$0 sm:$0xff] }
0x117d   : > { %v2781_v42 = vpop.f32.mrf.mxu0 }
0x117e   : > { %v2309_v42 = vld [vmem:[%s3433_s16] sm:$0xff] }
0x11e8   : > { %v1911_v43 = vpop.xlane.xlu1 %1910 }
0x11e9   : > { %2888 = vrcp.f32 %v1911_v43 }
0x11f6   : > { %v2889_v44 = vpop.eup %2888 }
0x11f7   : > { %v1913_v45 = vmul.f32 %v2889_v44, %v2887_v39 }
0x11f9   : > { %2790 = vmatmul.mubr.msk.f32.vlgmr.msra.gmra.mxu0 %vm843_vm3, %v1913_v45 }
0x11fa   : > { %2807 = vmatprep.mubr.msk.f32.mxu0 %vm2907_vm1, %v2906_v8  ;;  %2800 = vmatpush3.msra.mxu0 %v2580_v61  ;;  %v2392_v61 = vld [vmem:[%s3436_s19] sm:$0x1] }
0x11fb   : > { %2801 = vmatprep.subr.mxu0 %v2906_v8 }
0x11fc   : > { %2802 = vmatpush3.msra.mxu0 %v2579_v62 }
0x11fd   : > { %2803 = vmatprep.subr.mxu0 %v2906_v8 }
0x11fe   : > { %2804 = vmatpush3.msra.mxu0 %v2578_v63 }
0x11ff   : > { %2805 = vmatprep.subr.mxu0 %v2906_v8 }
0x1200   : > { %2806 = vmatpush3.msra.mxu0 %v2577_v0 }
0x1201   : > { %2829 = vmatprep.subr.mxu0 %v2906_v8 }
0x12b9   : > { %v1986_v47 = vpop.f32.mrf.mxu0 }
0x12ba   : > { %2797 = vmatmul.mubr.msk.f32.vlgmr.msra.gmra.mxu1 %vm768_vm2, %v1986_v47  ;;  %v2597_v47 = vld [vmem:[%s3431_s14 + $0x1] ss:$0 sm:$0xff] }
0x12bb   : > { %v2791_v48 = vpop.f32.mrf.mxu0  ;;  %2826 = vmatprep.mubr.msk.f32.mxu1 %vm2907_vm1, %v2906_v8  ;;  %2811 = vmatpush3.msra.mxu1 %v2591_v11 }
0x12bc   : > { %2812 = vmatprep.subr.mxu1 %v2906_v8 }
0x12bd   : > { %2813 = vmatpush3.msra.mxu1 %v2590_v12 }
0x12be   : > { %2814 = vmatprep.subr.mxu1 %v2906_v8 }
0x12bf   : > { %2815 = vmatpush3.msra.mxu1 %v2589_v13 }
0x12c0   : > { %2816 = vmatprep.subr.mxu1 %v2906_v8 }
0x12c1   : > { %2817 = vmatpush3.msra.mxu1 %v2588_v14 }
0x12c2   : > { %2818 = vmatprep.subr.mxu1 %v2906_v8 }
0x12c3   : > { %2819 = vmatpush3.msra.mxu1 %v2587_v15 }
0x12c4   : > { %2820 = vmatprep.subr.mxu1 %v2906_v8 }
0x12c5   : > { %2821 = vmatpush3.msra.mxu1 %v2586_v16 }
0x12c6   : > { %2822 = vmatprep.subr.mxu1 %v2906_v8 }
0x12c7   : > { %2823 = vmatpush3.msra.mxu1 %v2585_v17 }
0x12c8   : > { %2824 = vmatprep.subr.mxu1 %v2906_v8 }
0x12c9   : > { %2825 = vmatpush3.msra.mxu1 %v2584_v18 }
0x137a   : > { %v2059_v51 = vpop.f32.mrf.mxu1 }
0x137b   : > { %v2063_v52 = vadd.f32 %v2059_v51, %v1824_v50 }
0x137c   : > { %v2798_v53 = vpop.f32.mrf.mxu1 }
0x137d   : > { %v2064_v54 = vadd.f32 %v2063_v52, %v3232_v4  ;;  %v2391_v52 = vld [vmem:[%s3435_s18 + $0x18] sm:$0xff]  ;;  %v2390_v53 = vld [vmem:[%s3435_s18 + $0x10] sm:$0xff] }
0x137f   : > { %v2069_v55 = vsel %vm641_vm0, %v2064_v54, 0.0 }
0x1380   : > { %2070 = vadd.xlane.f32.xlu1 %v2069_v55  ;;  %v2388_v55 = vld [vmem:[%s3435_s18] sm:$0xff] }
0x1409   : > { %v2071_v56 = vpop.xlane.xlu1 %2070 }
0x140a   : > { %v2072_v57 = vmul.f32 0.03125, %v2071_v56  ;;  %v2313_v56 = vld [vmem:[%s3434_s17] sm:$0x1] }
0x140c   : > { %v2073_v58 = vsub.f32 %v2064_v54, %v2072_v57  ;;  %v2389_v54 = vld [vmem:[%s3435_s18 + $0x8] sm:$0xff] }
0x140e   : > { %v2074_v59 = vmul.f32 %v2073_v58, %v2073_v58 }
0x1410   : > { %v2075_v60 = vsel %vm641_vm0, %v2074_v59, 0.0 }
0x1411   : > { %2076 = vadd.xlane.f32.xlu1 %v2075_v60 }
0x149a   : > { %v2077_v1 = vpop.xlane.xlu1 %2076 }
0x149b   : > { %v2078_v2 = vmul.f32 0.03125, %v2077_v1 }
0x149d   : > { %v2079_v3 = vadd.f32 1e-12, %v2078_v2 }
0x149f   : > { %2890 = vrsqrt.f32 %v2079_v3 }
0x14ac   : > { %v2891_v4 = vpop.eup %2890 }
0x14ad   : > { %v2081_v6 = vmul.f32 %v2891_v4, %v2073_v58 }
0x14af   : > { %v2088_v9 = vmul.f32 %v2575_v5, %v2081_v6 }
0x14b1   : > { %v2095_v10 = vadd.f32 %v2576_v7, %v2088_v9 }
0x14b3   : > { %2808 = vmatmul.mubr.msk.f32.vlgmr.msra.gmra.mxu0 %vm641_vm0, %v2095_v10 }
0x14b4   : > { %2837 = vmatprep.mubr.msk.f32.mxu0 %vm2907_vm1, %v2906_v8  ;;  %2830 = vmatpush3.msra.mxu0 %v2312_v40 }
0x14b5   : > { %2831 = vmatprep.subr.mxu0 %v2906_v8 }
0x14b6   : > { %2832 = vmatpush3.msra.mxu0 %v2311_v26 }
0x14b7   : > { %2833 = vmatprep.subr.mxu0 %v2906_v8 }
0x14b8   : > { %2834 = vmatpush3.msra.mxu0 %v2310_v41 }
0x14b9   : > { %2835 = vmatprep.subr.mxu0 %v2906_v8 }
0x14ba   : > { %2836 = vmatpush3.msra.mxu0 %v2309_v42 }
0x14bb   : > { %2840 = vmatprep.subr.mxu0 %v2906_v8 }
0x1573   : > { %v2178_v20 = vpop.f32.mrf.mxu0 }
0x1574   : > { %v2179_v21 = vadd.f32 %v2582_v19, %v2178_v20 }
0x1575   : > { %v2809_v22 = vpop.f32.mrf.mxu0 }
0x1576   : > { %v2183_v23 = vmul.f32 0.70710677, %v2179_v21  ;;  %v2182_v25 = vmul.f32 0.5, %v2179_v21 }
0x1578   : > { %2892 = verf.f32 %v2183_v23 }
0x1585   : > { %v2893_v24 = vpop.eup %2892 }
0x1586   : > { %v2185_v27 = vadd.f32 1.0, %v2893_v24 }
0x1588   : > { %v2186_v28 = vmul.f32 %v2185_v27, %v2182_v25 }
0x158a   : > { %2827 = vmatmul.mubr.msk.f32.vlgmr.msra.gmra.mxu1 %vm1384_vm4, %v2186_v28 }
0x164a   : > { %v2273_v30 = vpop.f32.mrf.mxu1 }
0x164b   : > { %v2274_v31 = vadd.f32 %v2593_v29, %v2273_v30 }
0x164c   : > { %v2828_v32 = vpop.f32.mrf.mxu1 }
0x164d   : > { %v2277_v33 = vadd.f32 %v2274_v31, %v2095_v10 }
0x164f   : > { %v2282_v34 = vsel %vm641_vm0, %v2277_v33, 0.0 }
0x1650   : > { %2283 = vadd.xlane.f32.xlu1 %v2282_v34 }
0x16d9   : > { %v2284_v35 = vpop.xlane.xlu1 %2283 }
0x16da   : > { %v2285_v36 = vmul.f32 0.03125, %v2284_v35 }
0x16dc   : > { %v2286_v37 = vsub.f32 %v2277_v33, %v2285_v36 }
0x16de   : > { %v2287_v38 = vmul.f32 %v2286_v37, %v2286_v37 }
0x16e0   : > { %v2288_v39 = vsel %vm641_vm0, %v2287_v38, 0.0 }
0x16e1   : > { %2289 = vadd.xlane.f32.xlu0 %v2288_v39 }
0x176a   : > { %v2290_v43 = vpop.xlane.xlu0 %2289 }
0x176b   : > { %v2291_v44 = vmul.f32 0.03125, %v2290_v43 }
0x176d   : > { %v2292_v45 = vadd.f32 1e-12, %v2291_v44 }
0x176f   : > { %2894 = vrsqrt.f32 %v2292_v45 }
0x177c   : > { %v2895_v46 = vpop.eup %2894 }
0x177d   : > { %v2294_v48 = vmul.f32 %v2895_v46, %v2286_v37 }
0x177f   : > { %v2301_v50 = vmul.f32 %v2597_v47, %v2294_v48 }
0x1781   : > { %v2308_v51 = vadd.f32 %v2598_v49, %v2301_v50 }
0x1783   : > { %2838 = vmatmul.mubr.msk.f32.vlgmr.msra.gmra.mxu0 %vm641_vm0, %v2308_v51 }
0x1784   : > { %2848 = vmatprep.mubr.msk.f32.mxu0 %vm2907_vm1, %v2906_v8  ;;  %2841 = vmatpush3.msra.mxu0 %v2391_v52 }
0x1785   : > { %2842 = vmatprep.subr.mxu0 %v2906_v8 }
0x1786   : > { %2843 = vmatpush3.msra.mxu0 %v2390_v53 }
0x1787   : > { %2844 = vmatprep.subr.mxu0 %v2906_v8 }
0x1788   : > { %2845 = vmatpush3.msra.mxu0 %v2389_v54 }
0x1789   : > { %2846 = vmatprep.subr.mxu0 %v2906_v8 }
0x178a   : > { %2847 = vmatpush3.msra.mxu0 %v2388_v55 }
0x1843   : > { %v2383_v57 = vpop.f32.mrf.mxu0 }
0x1844   : > { %v2384_v58 = vadd.f32 %v2383_v57, %v2313_v56 }
0x1845   : > { %v2839_v59 = vpop.f32.mrf.mxu0 }
0x1846   : > { %2896 = vtanh.f32 %v2384_v58 }
0x1853   : > { %v2897_v60 = vpop.eup %2896 }
0x1854   : > { %2849 = vmatmul.mubr.msk.f32.vlgmr.msra.gmra.mxu0 %vm641_vm0, %v2897_v60 }
0x1914   : > { %v2462_v8 = vpop.f32.mrf.mxu0 }
0x1915   : > { %v2463_v62 = vadd.f32 %v2462_v8, %v2392_v61 }
0x1916   : > { %v2850_v63 = vpop.f32.mrf.mxu0 }
0x1917   : > { %2467 = vst.msk [vmem:[%s636_s24] sm:$0x1] %vm2466_vm5, %v2463_v62 }
0x1918 PF: > { %s30_s1 = sadd.s32 1, %s2904_s1  }
0x1919   : > { %p27_p4 = scmp.ge.s32.totalorder %s30_s1, 4  }
0x191b   :  { %29 = sbr.rel (!%p27_p4) target bundleno = 6 (0x6), region = 145 }

</bundles_post_ra>
